<compile_context>
chip_gen: v7x
topology: tpu7x:2x2x1
jax: 0.10.0
libtpu: 0.0.40
codegen_flags: <defaults>
</compile_context>

<pallas_src>
import jax
import jax.numpy as jnp
from jax import lax
from jax.experimental import pallas as pl
from jax.experimental.pallas import tpu as pltpu


def _vmem_capacity_bytes():
    """Per-generation VMEM capacity (v5e/v6e: 128 MiB, v7x: 64 MiB)."""
    try:
        info = pltpu.get_tpu_info()
        cap = getattr(info, "vmem_capacity_bytes", None)
        if cap:
            return int(cap)
    except Exception:
        pass
    return 64 * 1024 * 1024  # conservative fallback (v7x)


def _multihead_block_kernel(x_ref, wm_ref, bm_ref, w1_ref, b1_ref,
                            gamma_ref, beta_ref, w2_ref, b2_ref,
                            out_ref, ctx_ref):
    tb, C, _ = x_ref.shape              # samples in this grid step (static)
    post_group, ipg, opg = w1_ref.shape
    planes = post_group * opg

    wm_bf = wm_ref[...].astype(jnp.bfloat16)   # (head, C)  MXU operand in bf16
    bm = bm_ref[...]                           # (head, 1)  f32

    # ---------------- spatial_pool (pooling_type='att') ----------------
    # fori_loop (not static unroll) keeps the (head, HW) logits/exp temporaries'
    # vreg footprint fixed per iteration even when tb is raised.
    def spatial_pool_body(b, carry):
        xb = x_ref[b].astype(jnp.bfloat16)                               # (C, HW)
        # 1x1 conv_mask: (head, C) @ (C, HW) on the MXU, f32 accumulate.
        logits = jnp.dot(wm_bf, xb, preferred_element_type=jnp.float32) + bm
        # softmax over the spatial (lane) axis — f32 elementwise (v5e-safe).
        logits = logits - jnp.max(logits, axis=-1, keepdims=True)
        e = jnp.exp(logits)
        attn = e * pl.reciprocal(jnp.sum(e, axis=-1, keepdims=True), approx=True)
        # ctx[h, c] = sum_p attn[h, p] * x[c, p]: contraction over the trailing lane
        # axis of both operands (flash-attention q@k^T pattern), so the big (C, HW)
        # tile feeds the MXU in its natural layout, no transpose.
        ctx_ref[b] = lax.dot_general(
            attn.astype(jnp.bfloat16), xb, (((1,), (1,)), ((), ())),
            preferred_element_type=jnp.float32)                          # (head, C)
        return carry

    lax.fori_loop(0, tb, spatial_pool_body, 0)

    ctx = ctx_ref[...]                                                   # (tb, head, C)

    # ---------------- channel_add_conv[0]: grouped 1x1 conv ----------------
    # Default config: post_group == head_num, so group g == head g. One batched
    # matmul over the group axis; block-diagonal zeros never materialised.
    y1 = jnp.einsum('bgc,gco->bgo', ctx, w1_ref[...],
                    preferred_element_type=jnp.float32).reshape(tb, planes)
    y1 = y1 + b1_ref[...]                                                # (tb, planes)

    # ---------------- LayerNorm([planes,1,1]) + ReLU (f32) ----------------
    mu = jnp.mean(y1, axis=-1, keepdims=True)
    var = jnp.mean(jnp.square(y1 - mu), axis=-1, keepdims=True)
    y1n = (y1 - mu) * lax.rsqrt(var + 1e-5)
    y1n = jnp.maximum(y1n * gamma_ref[...] + beta_ref[...], 0.0)

    # ---------------- channel_add_conv[3]: final 1x1 conv ----------------
    y2 = lax.dot_general(y1n, w2_ref[...], (((1,), (1,)), ((), ())),
                         preferred_element_type=jnp.float32) + b2_ref[...]   # (tb, C)

    # ---------------- fusion: out = x + channel_add_term ----------------
    # Single vectorised broadcast-add over the whole block; Mosaic strip-mines it,
    # stores are lane-dense (unmasked vst when HW % 128 == 0).
    out_ref[...] = (x_ref[...] + y2.reshape(tb, C, 1)).astype(out_ref.dtype)


def multihead_block_forward(x_nchw, wm, bm, w1, b1, gamma, beta, w2, b2, *,
                            head_num=8, pre_group=1, post_group=8,
                            max_tb=None, stream_bf16=False, donate_x=False):
    """x_nchw: (B, C, H, W); weights in their native PyTorch 1x1-conv layouts:
       wm (head, C), bm (head,), w1 (planes, ipg), b1 (planes,),
       gamma/beta (planes,), w2 (C, planes), b2 (C,)."""
    B, C, H, W = x_nchw.shape
    HW = H * W
    head = wm.shape[0]
    planes, ipg = w1.shape
    if head != head_num:
        raise ValueError("conv_mask weight does not match head_num")
    # TODO(synk): only the default grouping (pre_group=1, post_group=head_num) is wired up.
    if pre_group != 1 or post_group != head_num * pre_group:
        raise NotImplementedError("only pre_group=1, post_group=head_num supported")
    if planes % post_group != 0 or ipg != head_num * C // post_group or ipg != C:
        raise ValueError("grouped conv shapes inconsistent with the default config")
    opg = planes // post_group

    xs = x_nchw.reshape(B, C, HW)
    if stream_bf16:
        # Halves HBM read traffic for x; output stays in x's original dtype.
        xs = xs.astype(jnp.bfloat16)

    # ---- per-generation tb / VMEM sizing ----
    x_item = jnp.dtype(xs.dtype).itemsize
    out_item = jnp.dtype(x_nchw.dtype).itemsize
    per_sample_bytes = 2 * (x_item + out_item) * C * HW   # x + out, double-buffered
    vmem_cap = _vmem_capacity_bytes()
    budget = int(0.6 * vmem_cap)                          # headroom for weights/temps
    tb_cap = max(1, budget // per_sample_bytes)
    if max_tb is not None:
        tb_cap = min(tb_cap, max_tb)
    if B >= 2:
        tb_cap = min(tb_cap, B // 2)                      # grid >= 2 (v7x megacore)
    tb_cap = int(max(1, min(tb_cap, B)))
    tb = max(d for d in range(1, tb_cap + 1) if B % d == 0)

    param_bytes = 4 * (head * C + head + post_group * ipg * opg + 3 * planes
                       + C * planes + C)
    step_bytes = per_sample_bytes * tb + param_bytes + 4 * tb * head * C  # + ctx scratch
    vmem_limit_bytes = int(min(0.75 * vmem_cap, max(32 * 1024 * 1024, 3 * step_bytes)))

    # ---- weight re-layouts (host side, one-time) ----
    # Grouped-conv weight stored WITHOUT the zero blocks: (post_group, ipg, opg).
    w1g = jnp.transpose(w1.reshape(post_group, opg, ipg), (0, 2, 1))
    bm2 = bm.reshape(head, 1)
    b1r = b1.reshape(1, planes)
    gammar = gamma.reshape(1, planes)
    betar = beta.reshape(1, planes)
    b2r = b2.reshape(1, C)

    grid_spec = pltpu.PrefetchScalarGridSpec(
        num_scalar_prefetch=0,
        grid=(B // tb,),
        in_specs=[
            pl.BlockSpec((tb, C, HW), lambda i: (i, 0, 0)),              # x
            pl.BlockSpec((head, C), lambda i: (0, 0)),                   # conv_mask W
            pl.BlockSpec((head, 1), lambda i: (0, 0)),                   # conv_mask b
            pl.BlockSpec((post_group, ipg, opg), lambda i: (0, 0, 0)),   # grouped W
            pl.BlockSpec((1, planes), lambda i: (0, 0)),                 # grouped b
            pl.BlockSpec((1, planes), lambda i: (0, 0)),                 # LN gamma
            pl.BlockSpec((1, planes), lambda i: (0, 0)),                 # LN beta
            pl.BlockSpec((C, planes), lambda i: (0, 0)),                 # final conv W
            pl.BlockSpec((1, C), lambda i: (0, 0)),                      # final conv b
        ],
        out_specs=pl.BlockSpec((tb, C, HW), lambda i: (i, 0, 0)),
        scratch_shapes=[pltpu.VMEM((tb, head, C), jnp.float32)],         # ctx
    )

    # Memory-bound hint for XLA scheduling around the custom call.
    flops = (4 * B * head * C * HW
             + 2 * B * post_group * ipg * opg
             + 2 * B * planes * C
             + 10 * B * planes)
    cost = pl.CostEstimate(
        flops=int(flops),
        transcendentals=int(B * head * HW),
        bytes_accessed=int((x_item + out_item) * B * C * HW + param_bytes))

    call_kwargs = {}
    if donate_x and not stream_bf16:
        # Alias x -> out (same shape/dtype); only when the caller does not reuse x.
        call_kwargs["input_output_aliases"] = {0: 0}

    out = pl.pallas_call(
        _multihead_block_kernel,
        out_shape=jax.ShapeDtypeStruct((B, C, HW), x_nchw.dtype),
        grid_spec=grid_spec,
        compiler_params=pltpu.CompilerParams(
            dimension_semantics=("parallel",),
            vmem_limit_bytes=vmem_limit_bytes,
        ),
        cost_estimate=cost,
        **call_kwargs,
    )(xs, wm, bm2, w1g, b1r, gammar, betar, w2, b2r)
    return out.reshape(B, C, H, W)


def reference_forward(x, wm, bm, w1, b1, gamma, beta, w2, b2, head_num, post_group):
    """Pure-JAX reference mirroring the PyTorch forward."""
    B, C, H, W = x.shape
    HW = H * W
    planes = w2.shape[1]
    xs = x.reshape(B, C, HW)
    logits = jnp.einsum('hc,bcp->bhp', wm, xs) + bm[None, :, None]
    attn = jax.nn.softmax(logits, axis=2)
    ctx = jnp.einsum('bhp,bcp->bhc', attn, xs).reshape(B, head_num * C)
    ipg = head_num * C // post_group
    opg = planes // post_group
    y1 = jnp.concatenate(
        [ctx[:, g * ipg:(g + 1) * ipg] @ w1[g * opg:(g + 1) * opg, :].T
         for g in range(post_group)], axis=1) + b1[None, :]
    mu = y1.mean(axis=1, keepdims=True)
    var = ((y1 - mu) ** 2).mean(axis=1, keepdims=True)
    y1n = (y1 - mu) / jnp.sqrt(var + 1e-5) * gamma[None, :] + beta[None, :]
    y1n = jnp.maximum(y1n, 0.0)
    y2 = y1n @ w2.T + b2[None, :]
    return x + y2[:, :, None, None]


if __name__ == "__main__":
    # Module config (defaults): pooling_type='att', fusion_types=('channel_add',)
    B, C, H, W = 8, 64, 16, 16          # HW = 256 -> lane-dense blocks/stores
    ratio = 0.25
    head_num, pre_group, post_group = 8, 1, 8
    planes = int(C * ratio)             # 16
    ipg = head_num * C // post_group    # 64 (== C in the default grouping)

    key = jax.random.PRNGKey(0)
    k = jax.random.split(key, 9)
    x = jax.random.normal(k[0], (B, C, H, W), jnp.float32)

    # conv_mask: Conv2d(C, head_num, 1)
    wm = 0.1 * jax.random.normal(k[1], (head_num, C), jnp.float32)
    bm = 0.1 * jax.random.normal(k[2], (head_num,), jnp.float32)
    # channel_add_conv[0]: Conv2d(head_num*C, planes, 1, groups=post_group)
    w1 = 0.1 * jax.random.normal(k[3], (planes, ipg), jnp.float32)
    b1 = 0.1 * jax.random.normal(k[4], (planes,), jnp.float32)
    # channel_add_conv[1]: LayerNorm([planes, 1, 1])
    gamma = 1.0 + 0.05 * jax.random.normal(k[5], (planes,), jnp.float32)
    beta = 0.05 * jax.random.normal(k[6], (planes,), jnp.float32)
    # channel_add_conv[3]: Conv2d(planes, C, 1)
    # NOTE: PyTorch's reset_parameters zero-inits this conv; random weights are used
    # here so the fused channel_add term is non-trivial for testing.
    w2 = 0.1 * jax.random.normal(k[7], (C, planes), jnp.float32)
    b2 = 0.1 * jax.random.normal(k[8], (C,), jnp.float32)

    out = multihead_block_forward(x, wm, bm, w1, b1, gamma, beta, w2, b2,
                                  head_num=head_num, pre_group=pre_group,
                                  post_group=post_group)
    out = jax.block_until_ready(out)

    ref = reference_forward(x, wm, bm, w1, b1, gamma, beta, w2, b2,
                            head_num, post_group)
    err = float(jnp.max(jnp.abs(out - ref)))
    assert out.shape == (B, C, H, W)
    assert err < 2e-2, f"max abs err {err}"
    print("KERNEL_OK")
</pallas_src>

<mosaic_0001>
module attributes {stable_mosaic.version = 11 : i64} {
  func.func @_multihead_block_kernel(%arg0: i32, %arg1: memref<4x64x256xf32, #tpu.memory_space<vmem>>, %arg2: memref<8x64xf32, #tpu.memory_space<vmem>>, %arg3: memref<8x1xf32, #tpu.memory_space<vmem>>, %arg4: memref<8x64x2xf32, #tpu.memory_space<vmem>>, %arg5: memref<1x16xf32, #tpu.memory_space<vmem>>, %arg6: memref<1x16xf32, #tpu.memory_space<vmem>>, %arg7: memref<1x16xf32, #tpu.memory_space<vmem>>, %arg8: memref<64x16xf32, #tpu.memory_space<vmem>>, %arg9: memref<1x64xf32, #tpu.memory_space<vmem>>, %arg10: memref<4x64x256xf32, #tpu.memory_space<vmem>>, %arg11: memref<4x8x64xf32, #tpu.memory_space<vmem>>) attributes {dimension_semantics = [#tpu.dimension_semantics<parallel>], iteration_bounds = array<i64: 2>, scalar_prefetch = 0 : i64, scratch_operands = 1 : i64, tpu.core_type = #tpu.core_type<tc>, window_params = [{transform_indices = @transform_0, window_bounds = array<i64: 4, 64, 256>}, {pipeline_mode = #tpu.pipeline_mode<synchronous>, transform_indices = @transform_1, window_bounds = array<i64: 8, 64>}, {pipeline_mode = #tpu.pipeline_mode<synchronous>, transform_indices = @transform_2, window_bounds = array<i64: 8, 1>}, {pipeline_mode = #tpu.pipeline_mode<synchronous>, transform_indices = @transform_3, window_bounds = array<i64: 8, 64, 2>}, {pipeline_mode = #tpu.pipeline_mode<synchronous>, transform_indices = @transform_4, window_bounds = array<i64: 1, 16>}, {pipeline_mode = #tpu.pipeline_mode<synchronous>, transform_indices = @transform_5, window_bounds = array<i64: 1, 16>}, {pipeline_mode = #tpu.pipeline_mode<synchronous>, transform_indices = @transform_6, window_bounds = array<i64: 1, 16>}, {pipeline_mode = #tpu.pipeline_mode<synchronous>, transform_indices = @transform_7, window_bounds = array<i64: 64, 16>}, {pipeline_mode = #tpu.pipeline_mode<synchronous>, transform_indices = @transform_8, window_bounds = array<i64: 1, 64>}, {transform_indices = @transform_9, window_bounds = array<i64: 4, 64, 256>}]} {
    %c0 = arith.constant 0 : index
    %c0_0 = arith.constant 0 : index
    %0 = vector.load %arg2[%c0, %c0_0] : memref<8x64xf32, #tpu.memory_space<vmem>>, vector<8x64xf32>
    %1 = arith.truncf %0 : vector<8x64xf32> to vector<8x64xbf16>
    %c0_1 = arith.constant 0 : index
    %c0_2 = arith.constant 0 : index
    %2 = vector.load %arg3[%c0_1, %c0_2] : memref<8x1xf32, #tpu.memory_space<vmem>>, vector<8x1xf32>
    %c0_i32 = arith.constant 0 : i32
    %c4_i32 = arith.constant 4 : i32
    %3 = arith.addi %c0_i32, %c4_i32 : i32
    %c1_i32 = arith.constant 1 : i32
    scf.for %arg12 = %c0_i32 to %3 step %c1_i32  : i32 {
      %48 = arith.index_cast %arg12 : i32 to index
      %c0_33 = arith.constant 0 : index
      %c0_34 = arith.constant 0 : index
      %49 = vector.load %arg1[%48, %c0_33, %c0_34] : memref<4x64x256xf32, #tpu.memory_space<vmem>>, vector<1x64x256xf32>
      %50 = vector.shape_cast %49 : vector<1x64x256xf32> to vector<64x256xf32>
      %51 = arith.truncf %50 : vector<64x256xf32> to vector<64x256xbf16>
      %cst_35 = arith.constant dense<0.000000e+00> : vector<8x256xf32>
      %52 = tpu.matmul %1, %51, %cst_35 {dimension_numbers = #tpu.dot_dimension_numbers<[1], [0], [0], [1], [0, 0, 1, 1], [], []>} : vector<8x64xbf16>, vector<64x256xbf16>, vector<8x256xf32> -> vector<8x256xf32>
      %53 = vector.broadcast %2 : vector<8x1xf32> to vector<8x256xf32>
      %54 = arith.addf %52, %53 : vector<8x256xf32>
      %cst_36 = arith.constant dense<0xFF800000> : vector<8xf32>
      %55 = vector.multi_reduction <maximumf>, %54, %cst_36 [1] : vector<8x256xf32> to vector<8xf32>
      %56 = vector.shape_cast %55 : vector<8xf32> to vector<8x1xf32>
      %57 = vector.broadcast %56 : vector<8x1xf32> to vector<8x256xf32>
      %58 = arith.subf %54, %57 : vector<8x256xf32>
      %59 = math.exp %58 : vector<8x256xf32>
      %cst_37 = arith.constant dense<0.000000e+00> : vector<8xf32>
      %60 = vector.multi_reduction <add>, %59, %cst_37 [1] : vector<8x256xf32> to vector<8xf32>
      %61 = vector.shape_cast %60 : vector<8xf32> to vector<8x1xf32>
      %62 = tpu.reciprocal %61 {approx = true} : vector<8x1xf32> -> vector<8x1xf32>
      %63 = vector.broadcast %62 : vector<8x1xf32> to vector<8x256xf32>
      %64 = arith.mulf %59, %63 : vector<8x256xf32>
      %65 = arith.truncf %64 : vector<8x256xf32> to vector<8x256xbf16>
      %cst_38 = arith.constant dense<0.000000e+00> : vector<8x64xf32>
      %66 = tpu.matmul %65, %51, %cst_38 {dimension_numbers = #tpu.dot_dimension_numbers<[1], [1], [0], [0], [0, 0, 1, 0], [], []>} : vector<8x256xbf16>, vector<64x256xbf16>, vector<8x64xf32> -> vector<8x64xf32>
      %67 = arith.index_cast %arg12 : i32 to index
      %c0_39 = arith.constant 0 : index
      %c0_40 = arith.constant 0 : index
      %68 = vector.load %arg11[%67, %c0_39, %c0_40] : memref<4x8x64xf32, #tpu.memory_space<vmem>>, vector<1x8x64xf32>
      %69 = vector.shape_cast %68 : vector<1x8x64xf32> to vector<8x64xf32>
      %70 = vector.shape_cast %66 : vector<8x64xf32> to vector<1x8x64xf32>
      tpu.vector_store %arg11[%67, %c0_39, %c0_40], %70 {strides = array<i32>} : memref<4x8x64xf32, #tpu.memory_space<vmem>>, vector<1x8x64xf32>,
    }
    %c4_i32_3 = arith.constant 4 : i32
    %c0_4 = arith.constant 0 : index
    %c0_5 = arith.constant 0 : index
    %c0_6 = arith.constant 0 : index
    %4 = vector.load %arg11[%c0_4, %c0_5, %c0_6] : memref<4x8x64xf32, #tpu.memory_space<vmem>>, vector<4x8x64xf32>
    %c0_7 = arith.constant 0 : index
    %c0_8 = arith.constant 0 : index
    %c0_9 = arith.constant 0 : index
    %5 = vector.load %arg4[%c0_7, %c0_8, %c0_9] : memref<8x64x2xf32, #tpu.memory_space<vmem>>, vector<8x64x2xf32>
    "tpu.trace_start"() <{level = 10 : i32, message = "bgc,gco->bgo"}> : () -> ()
    %cst = arith.constant dense<0.000000e+00> : vector<8x2x4xf32>
    %6 = tpu.matmul %5, %4, %cst {dimension_numbers = #tpu.dot_dimension_numbers<[1], [2], [2], [0], [0, 0, 0, 2, 1, 0], [0], [1]>} : vector<8x64x2xf32>, vector<4x8x64xf32>, vector<8x2x4xf32> -> vector<8x2x4xf32>
    %7 = tpu.transpose %6, [2, 0, 1] : vector<8x2x4xf32> -> vector<4x8x2xf32>
    "tpu.trace_stop"() : () -> ()
    %8 = vector.shape_cast %7 : vector<4x8x2xf32> to vector<4x16xf32>
    %c0_10 = arith.constant 0 : index
    %c0_11 = arith.constant 0 : index
    %9 = vector.load %arg5[%c0_10, %c0_11] : memref<1x16xf32, #tpu.memory_space<vmem>>, vector<1x16xf32>
    %10 = vector.broadcast %9 : vector<1x16xf32> to vector<4x16xf32>
    %11 = arith.addf %8, %10 : vector<4x16xf32>
    %cst_12 = arith.constant dense<0.000000e+00> : vector<4xf32>
    %12 = vector.multi_reduction <add>, %11, %cst_12 [1] : vector<4x16xf32> to vector<4xf32>
    %13 = vector.shape_cast %12 : vector<4xf32> to vector<4x1xf32>
    %cst_13 = arith.constant 1.600000e+01 : f32
    %14 = vector.broadcast %cst_13 : f32 to vector<4x1xf32>
    %15 = arith.divf %13, %14 : vector<4x1xf32>
    %16 = vector.broadcast %15 : vector<4x1xf32> to vector<4x16xf32>
    %17 = arith.subf %11, %16 : vector<4x16xf32>
    %18 = arith.mulf %17, %17 : vector<4x16xf32>
    %cst_14 = arith.constant dense<0.000000e+00> : vector<4xf32>
    %19 = vector.multi_reduction <add>, %18, %cst_14 [1] : vector<4x16xf32> to vector<4xf32>
    %20 = vector.shape_cast %19 : vector<4xf32> to vector<4x1xf32>
    %cst_15 = arith.constant 1.600000e+01 : f32
    %21 = vector.broadcast %cst_15 : f32 to vector<4x1xf32>
    %22 = arith.divf %20, %21 : vector<4x1xf32>
    %23 = vector.broadcast %15 : vector<4x1xf32> to vector<4x16xf32>
    %24 = arith.subf %11, %23 : vector<4x16xf32>
    %cst_16 = arith.constant 9.99999974E-6 : f32
    %25 = vector.broadcast %cst_16 : f32 to vector<4x1xf32>
    %26 = arith.addf %22, %25 : vector<4x1xf32>
    %27 = math.rsqrt %26 : vector<4x1xf32>
    %28 = vector.broadcast %27 : vector<4x1xf32> to vector<4x16xf32>
    %29 = arith.mulf %24, %28 : vector<4x16xf32>
    %c0_17 = arith.constant 0 : index
    %c0_18 = arith.constant 0 : index
    %30 = vector.load %arg6[%c0_17, %c0_18] : memref<1x16xf32, #tpu.memory_space<vmem>>, vector<1x16xf32>
    %31 = vector.broadcast %30 : vector<1x16xf32> to vector<4x16xf32>
    %32 = arith.mulf %29, %31 : vector<4x16xf32>
    %c0_19 = arith.constant 0 : index
    %c0_20 = arith.constant 0 : index
    %33 = vector.load %arg7[%c0_19, %c0_20] : memref<1x16xf32, #tpu.memory_space<vmem>>, vector<1x16xf32>
    %34 = vector.broadcast %33 : vector<1x16xf32> to vector<4x16xf32>
    %35 = arith.addf %32, %34 : vector<4x16xf32>
    %cst_21 = arith.constant 0.000000e+00 : f32
    %36 = vector.broadcast %cst_21 : f32 to vector<4x16xf32>
    %37 = arith.maximumf %35, %36 : vector<4x16xf32>
    %c0_22 = arith.constant 0 : index
    %c0_23 = arith.constant 0 : index
    %38 = vector.load %arg8[%c0_22, %c0_23] : memref<64x16xf32, #tpu.memory_space<vmem>>, vector<64x16xf32>
    %cst_24 = arith.constant dense<0.000000e+00> : vector<4x64xf32>
    %39 = tpu.matmul %37, %38, %cst_24 {dimension_numbers = #tpu.dot_dimension_numbers<[1], [1], [0], [0], [0, 0, 1, 0], [], []>} : vector<4x16xf32>, vector<64x16xf32>, vector<4x64xf32> -> vector<4x64xf32>
    %c0_25 = arith.constant 0 : index
    %c0_26 = arith.constant 0 : index
    %40 = vector.load %arg9[%c0_25, %c0_26] : memref<1x64xf32, #tpu.memory_space<vmem>>, vector<1x64xf32>
    %41 = vector.broadcast %40 : vector<1x64xf32> to vector<4x64xf32>
    %42 = arith.addf %39, %41 : vector<4x64xf32>
    %c0_27 = arith.constant 0 : index
    %c0_28 = arith.constant 0 : index
    %c0_29 = arith.constant 0 : index
    %43 = vector.load %arg1[%c0_27, %c0_28, %c0_29] : memref<4x64x256xf32, #tpu.memory_space<vmem>>, vector<4x64x256xf32>
    %44 = vector.shape_cast %42 : vector<4x64xf32> to vector<4x64x1xf32>
    %45 = vector.broadcast %44 : vector<4x64x1xf32> to vector<4x64x256xf32>
    %46 = arith.addf %43, %45 : vector<4x64x256xf32>
    %c0_30 = arith.constant 0 : index
    %c0_31 = arith.constant 0 : index
    %c0_32 = arith.constant 0 : index
    %47 = vector.load %arg10[%c0_30, %c0_31, %c0_32] : memref<4x64x256xf32, #tpu.memory_space<vmem>>, vector<4x64x256xf32>
    tpu.vector_store %arg10[%c0_30, %c0_31, %c0_32], %46 {strides = array<i32>} : memref<4x64x256xf32, #tpu.memory_space<vmem>>, vector<4x64x256xf32>,
    return
  }
  func.func @transform_0(%arg0: i32) -> (i32, i32, i32) {
    %c0_i32 = arith.constant 0 : i32
    %c0_i32_0 = arith.constant 0 : i32
    %c0_i32_1 = arith.constant 0 : i32
    return %arg0, %c0_i32, %c0_i32_0 : i32, i32, i32
  }
  func.func @transform_1(%arg0: i32) -> (i32, i32) {
    %c0_i32 = arith.constant 0 : i32
    %c0_i32_0 = arith.constant 0 : i32
    %c0_i32_1 = arith.constant 0 : i32
    return %c0_i32, %c0_i32_0 : i32, i32
  }
  func.func @transform_2(%arg0: i32) -> (i32, i32) {
    %c0_i32 = arith.constant 0 : i32
    %c0_i32_0 = arith.constant 0 : i32
    %c0_i32_1 = arith.constant 0 : i32
    return %c0_i32, %c0_i32_0 : i32, i32
  }
  func.func @transform_3(%arg0: i32) -> (i32, i32, i32) {
    %c0_i32 = arith.constant 0 : i32
    %c0_i32_0 = arith.constant 0 : i32
    %c0_i32_1 = arith.constant 0 : i32
    %c0_i32_2 = arith.constant 0 : i32
    return %c0_i32, %c0_i32_0, %c0_i32_1 : i32, i32, i32
  }
  func.func @transform_4(%arg0: i32) -> (i32, i32) {
    %c0_i32 = arith.constant 0 : i32
    %c0_i32_0 = arith.constant 0 : i32
    %c0_i32_1 = arith.constant 0 : i32
    return %c0_i32, %c0_i32_0 : i32, i32
  }
  func.func @transform_5(%arg0: i32) -> (i32, i32) {
    %c0_i32 = arith.constant 0 : i32
    %c0_i32_0 = arith.constant 0 : i32
    %c0_i32_1 = arith.constant 0 : i32
    return %c0_i32, %c0_i32_0 : i32, i32
  }
  func.func @transform_6(%arg0: i32) -> (i32, i32) {
    %c0_i32 = arith.constant 0 : i32
    %c0_i32_0 = arith.constant 0 : i32
    %c0_i32_1 = arith.constant 0 : i32
    return %c0_i32, %c0_i32_0 : i32, i32
  }
  func.func @transform_7(%arg0: i32) -> (i32, i32) {
    %c0_i32 = arith.constant 0 : i32
    %c0_i32_0 = arith.constant 0 : i32
    %c0_i32_1 = arith.constant 0 : i32
    return %c0_i32, %c0_i32_0 : i32, i32
  }
  func.func @transform_8(%arg0: i32) -> (i32, i32) {
    %c0_i32 = arith.constant 0 : i32
    %c0_i32_0 = arith.constant 0 : i32
    %c0_i32_1 = arith.constant 0 : i32
    return %c0_i32, %c0_i32_0 : i32, i32
  }
  func.func @transform_9(%arg0: i32) -> (i32, i32, i32) {
    %c0_i32 = arith.constant 0 : i32
    %c0_i32_0 = arith.constant 0 : i32
    %c0_i32_1 = arith.constant 0 : i32
    return %arg0, %c0_i32, %c0_i32_0 : i32, i32, i32
  }
}

</mosaic_0001>

<bundles_post_ra>
// kernel: tpu_custom_call.1
= control target key start
LH: loop header
LB: loop body
LE: loop exit
PB: predicated region body
PF: predicated region fallthrough
CT: control target
= control target key end

     0   :  { %14 = vsyncpa [#allocation4], 0  ;;  %s8266_s0 = inlined_call_operand.hbm [shape: f32[8,64,256], index: 0, kind: input, shape index: {}]   ;;  %s8267_s1 = inlined_call_operand.vmem [shape: f32[8,64], index: 1, kind: input, shape index: {}]   ;;  %s8268_s2 = inlined_call_operand.vmem [shape: f32[8,1], index: 2, kind: input, shape index: {}]   ;;  %s8269_s3 = inlined_call_operand.vmem [shape: f32[8,64,2], index: 3, kind: input, shape index: {}]   ;;  %s8270_s4 = inlined_call_operand.vmem [shape: f32[1,16], index: 4, kind: input, shape index: {}]   ;;  %s8271_s5 = inlined_call_operand.vmem [shape: f32[1,16], index: 5, kind: input, shape index: {}]   ;;  %s8272_s6 = inlined_call_operand.vmem [shape: f32[1,16], index: 6, kind: input, shape index: {}]   ;;  %s8273_s7 = inlined_call_operand.vmem [shape: f32[64,16], index: 7, kind: input, shape index: {}]   ;;  %s8274_s8 = inlined_call_operand.vmem [shape: f32[1,64], index: 8, kind: input, shape index: {}]   ;;  %s8275_s9 = inlined_call_operand.hbm [shape: f32[8,64,256], index: 9, kind: output, shape index: {}]  }
   0x1   :  { %16 = vsyncpa [#allocation4 + $0x1], 0 }
   0x2   :  { %17 = vsyncpa [#allocation5], 0 }
   0x3   :  { %19 = vsyncpa [#allocation5 + $0x1], 0  ;;  %s6903_s30 = smov 0   ;;  %s6905_s10 = smov 0  }
   0x4   :  { %s6907_s11 = smov 0   ;;  %s6909_s12 = smov 0  }
   0x5 LB: > { %s6924_s13 = sadd.s32 4294967295, %s6828_s12   ;;  %s6234_s14 = sadd.s32 4294967294, %s6828_s12   ;;  %s6828_s12 = sphi %s6909_s12, %s8322_s12   ;;  %s6824_s11 = sphi %s6907_s11, %s8321_s11   ;;  %s6820_s10 = sphi %s6905_s10, %s8320_s10   ;;  %s6816_s30 = sphi %s6903_s30, %s8319_s30  }
   0x6   : > { %s6928_s15 = sadd.s32 1, %s6828_s12   ;;  %s32_s16 = sadd.s32 1, %s6824_s11 }
   0x7   : > { %s29_s17 = ssub.s32 %s6828_s12, %s6928_s15  ;;  %p39_p0 = scmp.ne.s32.totalorder %s6824_s11, %s6820_s10 }
   0x8   : > { %p30_p1 = scmp.eq.s32.totalorder %s29_s17, 0  ;;  %p40_p2 = scmp.eq.s32.totalorder %s6828_s12, 0 }
   0x9   : > { %p45_p3 = scmp.ne.s32.totalorder %s6820_s10, %s6816_s30  ;;  %p46_p4 = scmp.eq.s32.totalorder %s6924_s13, 0 }
   0xa   : > { %s6940_s18 = scalar_select %p30_p1, %s6824_s11, %s32_s16  }
   0xb   : > { %p6942_p5 = por %p40_p2, %p39_p0  ;;  %p6946_p6 = por %p46_p4, %p45_p3 }
   0xc   : > { %p237_p7 = scmp.eq.s32.totalorder %s6924_s13, 1  ;;  %p243_p8 = scmp.eq.s32.totalorder %s6234_s14, 1 }
   0xd   : > { %p6660_p10 = scmp.lt.s32.totalorder %s6828_s12, 2  ;;  %s287_s23 = sand.u32 1, %s6824_s11  }
   0xe   : > { %p6953_p11 = por %p237_p7, %p39_p0  ;;  %p6957_p12 = por %p243_p8, %p45_p3 }
   0xf   : > { %s6280_s24 = sshll.u32 %s6828_s12, 13  ;;  %s6237_s25 = sshll.u32 %s287_s23, 9 }
  0x10   : > { %s8285_s21 = scalar_select %p6953_p11, 1, 0 }
  0x11   : > { %s8286_s22 = scalar_select %p6957_p12, 1, 0 }
  0x12   : > { %s6966_s28 = scalar_lea.hbm %s8266_s0, %s6280_s24  ;;  %s291_s29 = scalar_lea.vmem [#allocation3], %s6237_s25 }
  0x13   : > { %s299_s14 = sshll.u32 %s291_s29, 4  ;;  %p6970_p13 = pnand %p6660_p10, %p6942_p5  ;;  %s6974_s14 = int_to_ptr.vmem [resolvable:$true] %s299_s14 }
  0x14   : > { %s6976_s17 = scalar_lea.sflag [#allocation4], %s287_s23  ;;  %s6728_s26 = scalar_lea.hbm %s6966_s28, 8192 }
  0x15   : > { %p6729_p0 = scmp.ne.s32.totalorder %s6966_s28, %s6728_s26  ;;  %p6730_p1 = pneg %p6970_p13 }
  0x16   : > { %s6733_s25 = scalar_lea.hbm %s8266_s0, 16384  ;;  %p6734_p4 = scmp.lt.u32.totalorder %s6966_s28, %s8266_s0 }
  0x17   : > { %p6731_p2 = pnand %p6730_p1, %p6729_p0  ;;  %p6735_p5 = scmp.lt.u32.totalorder %s6733_s25, %s6728_s26 }
  0x18   : > { %p6737_p8 = scmp.lt.u32.totalorder %s6728_s26, %s6966_s28 }
  0x19   : > { %p6732_p3 = pneg %p6731_p2  ;;  %p6736_p7 = por %p6735_p5, %p6734_p4 }
  0x1b   : > { %p6738_p10 = por %p6737_p8, %p6736_p7 }
  0x1d   : > { %p6739_p9 = pnand %p6738_p10, %p6732_p3 }
  0x1f   : > { %6742 = shalt.err (!%p6739_p9)
}
  0x20   : > { %s6743_s23 = scalar_lea.vmem %s6974_s14, 8192  ;;  %s6834_s24 = smov [#allocation3]  }
  0x21   : > { %p6744_p0 = scmp.ne.s32.totalorder %s6974_s14, %s6743_s23  ;;  %s6748_s19 = sshll.u32 %s6834_s24, 4  ;;  %s6749_s19 = int_to_ptr.vmem [resolvable:$false] %s6748_s19 }
  0x22   : > { %s6750_s27 = scalar_lea.vmem %s6749_s19, 16384  ;;  %p6751_p11 = scmp.lt.s32.totalorder %s6974_s14, %s6749_s19 }
  0x23   : > { %p6746_p2 = pnand %p6744_p0, %p6730_p1  ;;  %p6752_p4 = scmp.lt.s32.totalorder %s6750_s27, %s6743_s23 }
  0x25   : > { %p6747_p12 = pneg %p6746_p2  ;;  %p6753_p5 = por %p6752_p4, %p6751_p11 }
  0x27   : > { %p6754_p7 = pnand %p6753_p5, %p6747_p12 }
  0x29   : > { %6757 = shalt.err (!%p6754_p7)
}
  0x2a   : > { %s6835_s26 = smov 256   ;;  %s6836_s25 = smov 16  }
  0x2b   : > { %6655 = dma.hbm_to_vmem [thread:$0]  (!%p6970_p13), %s6966_s28, 8192, %s6974_s14, %s6976_s17, %s6835_s26, %s6835_s26, %s6836_s25  }
  0x2c   : > { %p6241_p9 = scmp.ge.s32.totalorder %s6828_s12, 1  ;;  %p307_p1 = scmp.lt.s32.totalorder %s6828_s12, 3 }
  0x2e   : > { %p308_p3 = pnand %p6241_p9, %p307_p1 }
  0x30   : > { %311 = sbr.rel (%p308_p3) target bundleno = 2568 (0xa08), region = 56 }
  0x37   : > { %s7007_s29 = sand.u32 1, %s6820_s10  }
  0x38   : > { %s6242_s23 = sshll.u32 %s7007_s29, 9  ;;  %s314_s24 = scalar_lea.sflag [#allocation4], %s7007_s29 }
  0x39   : > { %s7011_s19 = scalar_lea.vmem [#allocation3], %s6242_s23 }
  0x3a   : > { %6807 = dma.done.wait (%p6946_p6), %s314_s24, 8192  }
  0x3b   : > { %6809 = vsyncadd (%p6946_p6), %s314_s24, 4294959104  ;;  %v7020_v0 = vld [vmem:[%s8267_s1] sm:$0xff]  ;;  %s7029_s27 = scalar_lea.vmem [#allocation6], %s6242_s23  ;;  %s7031_s26 = smov 0  }
  0x3c   : > { %v7025_v1 = vld [vmem:[%s8268_s2] sm:$0xff]  ;;  %v356_v2 = vpack.c.bf16 %v7020_v0, %v7020_v0 }
  0x3d LB: >> { %v6837_v3 = vmov 0   ;;  %s6281_s20 = sshll.u32 %s6832_s26, 7  ;;  %vm396_vm0 = vcmask 523264   ;;  %s6247_s23 = sshll.u32 %s6832_s26, 3  ;;  %s6832_s26 = sphi %s7031_s26, %s363_s26  }
  0x3e   : >> { %432 = vmatprep.mubr.bf16.mxu0 %v6837_v3  ;;  %6719 = vset.pattern.permute.xlu0 %v6837_v3  ;;  %s7039_s25 = scalar_lea.vmem %s7011_s19, %s6281_s20 [#allocation3]  ;;  %s499_s24 = scalar_lea.vmem [#allocation2], %s6247_s23 }
  0x3f   : >> { %393 = vperm.xlu0 %6719, %v7025_v1   ;;  %v368_v4 = vld [vmem:[%s7039_s25 + $0x8] sm:$0xff]  ;;  %v370_v5 = vld [vmem:[%s7039_s25 + $0x18] sm:$0xff]  ;;  %v367_v6 = vld [vmem:[%s7039_s25] sm:$0xff]  ;;  %s363_s26 = sadd.s32 1, %s6832_s26  }
  0x40   : >> { %v384_v7 = vpack.c.bf16 %v370_v5, %v368_v4  ;;  %v369_v8 = vld [vmem:[%s7039_s25 + $0x10] sm:$0xff]  ;;  %v372_v9 = vld [vmem:[%s7039_s25 + $0x28] sm:$0xff]  ;;  %v374_v10 = vld [vmem:[%s7039_s25 + $0x38] sm:$0xff]  ;;  %p360_p6 = scmp.ge.s32.totalorder %s363_s26, 4  }
  0x41   : >> { %v383_v11 = vpack.c.bf16 %v369_v8, %v367_v6  ;;  %v386_v12 = vpack.c.bf16 %v374_v10, %v372_v9  ;;  %v371_v13 = vld [vmem:[%s7039_s25 + $0x20] sm:$0xff]  ;;  %v373_v14 = vld [vmem:[%s7039_s25 + $0x30] sm:$0xff]  ;;  %v376_v15 = vld [vmem:[%s7039_s25 + $0x48] sm:$0xff]  ;;  %v6838_v6 = vmov (%p360_p6), 1983009808   ;;  %v702_v8 = vlaneseq (%p360_p6)  ;;  %s6843_s16 = smov (%p360_p6), 4  }
  0x42   : >> { %400 = vmatprep.subr.bf16.mxu0 %v384_v7  ;;  %v378_v16 = vld [vmem:[%s7039_s25 + $0x58] sm:$0xff]  ;;  %458 = vmatprep.subr.bf16.mxu1 %v384_v7  ;;  %v385_v17 = vpack.c.bf16 %v373_v14, %v371_v13  ;;  %v375_v19 = vld [vmem:[%s7039_s25 + $0x40] sm:$0xff]  ;;  %v377_v20 = vld [vmem:[%s7039_s25 + $0x50] sm:$0xff]  ;;  %v700_v7 = vunpack.c.l.s4 (%p360_p6), %v6838_v6  ;;  %v6839_v13 = vmov (%p360_p6), 1934713408   ;;  %vm6842_vm1 = vmmov (%p360_p6), 0  }
  0x43   : >> { %401 = vmatpush1.bf16.msra.mxu0 %v383_v11  ;;  %459 = vmatpush1.bf16.xpose.msra.mxu1 %v383_v11  ;;  %v388_v18 = vpack.c.bf16 %v378_v16, %v376_v15  ;;  %v380_v21 = vld [vmem:[%s7039_s25 + $0x68] sm:$0xff]  ;;  %v382_v22 = vld [vmem:[%s7039_s25 + $0x78] sm:$0xff]  ;;  %v387_v23 = vpack.c.bf16 %v377_v20, %v375_v19  ;;  %v379_v25 = vld [vmem:[%s7039_s25 + $0x60] sm:$0xff]  ;;  %v732_v14 = vunpack.c.l.s4 (%p360_p6), %v6839_v13  ;;  %s6844_s17 = smov (%p360_p6), 2   ;;  %s6845_s26 = smov (%p360_p6), 6   ;;  %vm5638_vm2 = vcmask (%p360_p6), 15360  }
  0x44   : >> { %402 = vmatprep.subr.bf16.mxu0 %v386_v12  ;;  %460 = vmatprep.subr.bf16.mxu1 %v386_v12  ;;  %v390_v24 = vpack.c.bf16 %v382_v22, %v380_v21  ;;  %v381_v26 = vld [vmem:[%s7039_s25 + $0x70] sm:$0xff]  ;;  %v701_v11 = vunpack.c.0.s8 (%p360_p6), %v700_v7  ;;  %v7090_v12 = vshrl.u32 (%p360_p6), %v702_v8, 7  ;;  %s6846_s20 = smov (%p360_p6), 12   ;;  %s6847_s25 = smov (%p360_p6), 8   ;;  %vm5640_vm3 = vcmask (%p360_p6), 31744  }
  0x45   : >> { %v389_v27 = vpack.c.bf16 %v381_v26, %v379_v25  ;;  %v733_v19 = vunpack.c.0.s8 (%p360_p6), %v732_v14  ;;  %s6848_s23 = smov (%p360_p6), 10   ;;  %vm5642_vm4 = vcmask (%p360_p6), 48128   ;;  %vm5644_vm5 = vcmask (%p360_p6), 64512   ;;  %p8316_p12 = scmp.ne.s32.totalorder (%p360_p6), %s8285_s21, 0 }
  0x46   : > { %8288 = vst [vmem:[#allocation9_spill] sm:$0xff] (%p360_p6), %v7090_v12  ;;  %vm5646_vm6 = vcmask (%p360_p6), 80896   ;;  %vm5648_vm7 = vcmask (%p360_p6), 97280   ;;  %vm5650_vm8 = vcmask (%p360_p6), 113664   ;;  %vm5660_vm9 = vcmask (%p360_p6), 125952  }
  0x47   : >> { %403 = vmatpush1.bf16.msra.mxu0 %v385_v17  ;;  %vm5707_vm10 = vcmask (%p360_p6), 130048  }
  0x48   : >> { %404 = vmatprep.subr.bf16.mxu0 %v388_v18  ;;  %vm8040_vm11 = vmpackc.low (%p360_p6), %vm5707_vm10, %vm5707_vm10 }
  0x4b   : >> { %405 = vmatpush1.bf16.msra.mxu0 %v387_v23  ;;  %461 = vmatpush1.bf16.xpose.msra.mxu1 %v385_v17 }
  0x4c   : >> { %406 = vmatprep.subr.bf16.mxu0 %v390_v24  ;;  %462 = vmatprep.subr.bf16.mxu1 %v388_v18  ;;  %v7097_v18 = vsub.s32 (%p360_p6), %v701_v11, %v7090_v12 }
  0x4f   : >> { %407 = vmatpush1.bf16.msra.mxu0 %v389_v27 }
  0x52   : >> { %6246 = vmatmul.mubr.msk.bf16.vlgmr.msra.gmra.mrb[0].mxu0 %vm396_vm0, %v356_v2 }
  0x53   : >> { %463 = vmatpush1.bf16.xpose.msra.mxu1 %v387_v23 }
  0x54   : >> { %464 = vmatprep.subr.bf16.mxu1 %v390_v24 }
  0x5b   : >> { %465 = vmatpush1.bf16.xpose.msra.mxu1 %v389_v27  ;;  %v7102_v27 = vsub.s32 (%p360_p6), %v733_v19, %v7090_v12 }
  0xbe   : >> { %v394_v28 = vpop.permute.xlu0 %393 }
 0x125   : >> { %v434_v29 = vpop.f32.mrb[0].mxu0 }
 0x126   : >> { %v435_v30 = vadd.f32 %v434_v29, %v394_v28  ;;  %v436_v31 = vpop.f32.mrb[1].mxu0 }
 0x127   : >> { %v437_v32 = vadd.f32 %v436_v31, %v394_v28  ;;  %v438_v33 = vpop.f32.mrb[2].mxu0 }
 0x128   : >> { %v439_v34 = vpop.f32.mrb[3].mxu0 }
 0x129   : >> { %v441_v35 = vmax.f32 %v435_v30, %v437_v32 }
 0x12b   : >> { %442 = vmax.xlane.f32.xlu0 %v441_v35 }
 0x1b8   : >> { %v443_v36 = vpop.xlane.xlu0 %442 }
 0x1b9   : >> { %v444_v37 = vsub.f32 %v435_v30, %v443_v36  ;;  %v445_v38 = vsub.f32 %v437_v32, %v443_v36  ;;  %v8277_v36 = vmov (%p360_p6), 0.0  }
 0x1ba   : > { %6419 = vmatprep.mubr.msk.f32.mxu0 (%p360_p6), %vm6842_vm1, %v8277_v36 }
 0x1bb   : >> { %v446_v39 = vmul.f32 1.442695, %v444_v37  ;;  %v448_v40 = vmul.f32 1.442695, %v445_v38 }
 0x1bd   : >> { %6720 = vpow2.f32 %v446_v39 }
 0x1be   : >> { %6722 = vpow2.f32 %v448_v40 }
 0x1c7   : >> { %v6721_v41 = vpop.eup %6720 }
 0x1c8   : >> { %v6723_v42 = vpop.eup %6722 }
 0x1c9   : >> { %v450_v43 = vadd.f32 %v6723_v42, %v6721_v41 }
 0x1cb   : >> { %451 = vadd.xlane.f32.xlu1 %v450_v43 }
 0x258   : >> { %v452_v44 = vpop.xlane.xlu1 %451 }
 0x259   : >> { %6724 = vrcp.f32 %v452_v44 }
 0x263   : >> { %v6725_v45 = vpop.eup %6724 }
 0x264   : >> { %v455_v46 = vmul.f32 %v6725_v45, %v6723_v42  ;;  %v454_v47 = vmul.f32 %v6725_v45, %v6721_v41 }
 0x266   : >> { %v457_v48 = vpack.c.bf16 %v455_v46, %v455_v46  ;;  %v456_v49 = vpack.c.bf16 %v454_v47, %v454_v47 }
 0x268   : >> { %490 = vmatprep.mubr.bf16.mxu1 %v457_v48 }
 0x269   : >> { %491 = vmatmul.mubr.bf16.vlgmr.msra.gmra.mrb[0].mxu1 %v456_v49 }
 0x26a   : > { %6381 = vmatprep.mubr.msk.f32.mxu1 (%p360_p6), %vm6842_vm1, %v8277_v36 }
 0x339   : > { %362 = sbr.rel (!%p360_p6) target bundleno = 61 (0x3d), region = 110 }
 0x33c   : >> { %v492_v50 = vpop.f32.mrb[0].mxu1 }
 0x33d   : >> { %500 = vst.msk [vmem:[%s499_s24] sm:$0xff] %vm396_vm0, %v492_v50  ;;  %v494_v51 = vpop.f32.mrb[1].mxu1  ;;  %s6849_s24 = smov (%p360_p6), 14  }
 0x33e   : >> { %v495_v52 = vpop.f32.mrb[2].mxu1 }
 0x33f   : >> { %v496_v53 = vpop.f32.mrb[3].mxu1 }
 0x344   : > { %v503_v54 = vld [vmem:[#allocation2 + $0x10] sm:$0xff]  ;;  %v501_v55 = vld [vmem:[#allocation2] sm:$0xff]  ;;  %v504_v56 = vld [vmem:[#allocation2 + $0x18] sm:$0xff] }
 0x345   : > { %633 = vxpose.xlu1.b32.start.end [1/1] (short) (narrow) %v503_v54, 64  ;;  %569 = vxpose.xlu0.b32.start.end [1/1] (short) (narrow) %v501_v55, 64  ;;  %v502_v57 = vld [vmem:[#allocation2 + $0x8] sm:$0xff] }
 0x362   : > { %665 = vxpose.xlu1.b32.start.end [1/1] (short) (narrow) %v504_v56, 64  ;;  %601 = vxpose.xlu0.b32.start.end [1/1] (short) (narrow) %v502_v57, 64 }
 0x3c5   : > { %v649_v58 = vpop.trf.xlu1  ;;  %v585_v59 = vpop.trf.xlu0 }
 0x3c6   : > { %v697_v17 = vcombine.low %v585_v59, %v649_v58  ;;  %v698_v24 = vcombine.high %v585_v59, %v649_v58 }
 0x3c8   : > { %v705_v25 = vrot.slane %v697_v17, %v7097_v18  ;;  %v712_v34 = vrot.slane %v698_v24, %v7097_v18 }
 0x3c9   : > { %v7066_v60 = vpop.trf.xlu1  ;;  %v7068_v61 = vpop.trf.xlu0 }
 0x3ca   : > { %v765_v40 = vcombine.low %v7068_v61, %v7066_v60  ;;  %v766_v50 = vcombine.high %v7068_v61, %v7066_v60 }
 0x3cc   : > { %v773_v45 = vrot.slane %v765_v40, %v7097_v18  ;;  %v780_v57 = vrot.slane %v766_v50, %v7097_v18 }
 0x3cd   : > { %v7070_v62 = vpop.trf.xlu1  ;;  %v7072_v63 = vpop.trf.xlu0 }
 0x3ce   : > { %v833_v6 = vcombine.low %v7072_v63, %v7070_v62 }
 0x3d0   : > { %v841_v14 = vrot.slane %v833_v6, %v7097_v18 }
 0x3d1   : > { %v7074_v3 = vpop.trf.xlu1  ;;  %v7076_v0 = vpop.trf.xlu0 }
 0x3d5   : > { %v7078_v1 = vpop.trf.xlu1  ;;  %v7080_v2 = vpop.trf.xlu0 }
 0x3d9   : > { %v7082_v4 = vpop.trf.xlu1  ;;  %v7084_v5 = vpop.trf.xlu0 }
 0x3dd   : > { %v7086_v9 = vpop.trf.xlu1  ;;  %v7088_v10 = vpop.trf.xlu0 }
 0x3e1   : > { %v7092_v15 = vpop.trf.xlu1  ;;  %v7094_v16 = vpop.trf.xlu0 }
 0x3e5   : > { %v681_v20 = vpop.trf.xlu1  ;;  %v617_v21 = vpop.trf.xlu0 }
 0x3e6   : > { %v713_v22 = vcombine.low %v617_v21, %v681_v20  ;;  %v714_v23 = vcombine.high %v617_v21, %v681_v20 }
 0x3e8   : > { %v721_v26 = vrot.slane %v713_v22, %v7097_v18  ;;  %v728_v30 = vrot.slane %v714_v23, %v7097_v18  ;;  %v834_v22 = vcombine.high %v7072_v63, %v7070_v62 }
 0x3e9   : > { %v682_v31 = vpop.trf.xlu1  ;;  %v618_v32 = vpop.trf.xlu0 }
 0x3ea   : > { %v729_v28 = vcombine.low %v705_v25, %v721_v26  ;;  %v730_v29 = vcombine.high %v705_v25, %v721_v26  ;;  %v781_v35 = vcombine.low %v618_v32, %v682_v31  ;;  %v745_v39 = vcombine.low %v712_v34, %v728_v30 }
 0x3eb   : > { %v746_v43 = vcombine.high %v712_v34, %v728_v30  ;;  %v782_v46 = vcombine.high %v618_v32, %v682_v31  ;;  %v848_v30 = vrot.slane %v834_v22, %v7097_v18 }
 0x3ec   : > { %v737_v33 = vrot.slane %v729_v28, %v7102_v27  ;;  %v744_v38 = vrot.slane %v730_v29, %v7102_v27  ;;  %v753_v42 = vrot.slane %v745_v39, %v7102_v27  ;;  %v789_v44 = vrot.slane %v781_v35, %v7097_v18 }
 0x3ed   : > { %v760_v48 = vrot.slane %v746_v43, %v7102_v27  ;;  %v796_v54 = vrot.slane %v782_v46, %v7097_v18  ;;  %v683_v55 = vpop.trf.xlu1  ;;  %v619_v56 = vpop.trf.xlu0 }
 0x3ee   : > { %1241 = vxpose.xlu0.b32.start.end [1/1] (short) (narrow) %v737_v33, 8  ;;  %v761_v37 = vcombine.high %v737_v33, %v8277_v36  ;;  %v762_v41 = vcombine.high %v744_v38, %v8277_v36  ;;  %v763_v47 = vcombine.high %v753_v42, %v8277_v36  ;;  %v797_v49 = vcombine.low %v773_v45, %v789_v44 }
 0x3ef   : > { %v764_v51 = vcombine.high %v760_v48, %v8277_v36  ;;  %v798_v53 = vcombine.high %v773_v45, %v789_v44  ;;  %v849_v58 = vcombine.low %v619_v56, %v683_v55  ;;  %v813_v61 = vcombine.low %v780_v57, %v796_v54 }
 0x3f0   : > { %1273 = vxpose.xlu1.b32.start.end [1/1] (short) (narrow) %v761_v37, 8  ;;  %v805_v52 = vrot.slane %v797_v49, %v7102_v27  ;;  %v814_v11 = vcombine.high %v780_v57, %v796_v54  ;;  %v850_v17 = vcombine.high %v619_v56, %v683_v55  ;;  %v901_v33 = vcombine.low %v7076_v0, %v7074_v3 }
 0x3f1   : > { %v812_v60 = vrot.slane %v798_v53, %v7102_v27  ;;  %v821_v8 = vrot.slane %v813_v61, %v7102_v27  ;;  %v857_v13 = vrot.slane %v849_v58, %v7097_v18  ;;  %v684_v28 = vpop.trf.xlu1  ;;  %v620_v29 = vpop.trf.xlu0  ;;  %v902_v44 = vcombine.high %v7076_v0, %v7074_v3 }
 0x3f2   : > { %1305 = vxpose.xlu0.b32.start.end [1/1] (short) (narrow) %v744_v38, 8  ;;  %v829_v59 = vcombine.high %v805_v52, %v8277_v36  ;;  %v828_v20 = vrot.slane %v814_v11, %v7102_v27  ;;  %v864_v26 = vrot.slane %v850_v17, %v7097_v18  ;;  %v917_v31 = vcombine.low %v620_v29, %v684_v28 }
 0x3f3   : > { %v830_v7 = vcombine.high %v812_v60, %v8277_v36  ;;  %v831_v19 = vcombine.high %v821_v8, %v8277_v36  ;;  %v865_v21 = vcombine.low %v841_v14, %v857_v13  ;;  %v866_v25 = vcombine.high %v841_v14, %v857_v13 }
 0x3f4   : > { %1337 = vxpose.xlu1.b32.start.end [1/1] (short) (narrow) %v762_v41, 8  ;;  %v832_v23 = vcombine.high %v828_v20, %v8277_v36  ;;  %v881_v63 = vcombine.low %v848_v30, %v864_v26  ;;  %v882_v37 = vcombine.high %v848_v30, %v864_v26  ;;  %v925_v38 = vrot.slane %v917_v31, %v7097_v18 }
 0x3f5   : > { %v873_v24 = vrot.slane %v865_v21, %v7102_v27  ;;  %v880_v62 = vrot.slane %v866_v25, %v7102_v27  ;;  %v909_v39 = vrot.slane %v901_v33, %v7097_v18  ;;  %v918_v40 = vcombine.high %v620_v29, %v684_v28  ;;  %v685_v50 = vpop.trf.xlu1 }
 0x3f6   : > { %1369 = vxpose.xlu0.b32.start.end [1/1] (short) (narrow) %v753_v42, 8  ;;  %v889_v35 = vrot.slane %v881_v63, %v7102_v27  ;;  %v896_v42 = vrot.slane %v882_v37, %v7102_v27  ;;  %v8279_v49 = vmov 0.0|0.0   ;;  %v969_v55 = vcombine.low %v7080_v2, %v7078_v1 }
 0x3f7   : > { %v897_v32 = vcombine.high %v873_v24, %v8277_v36  ;;  %v898_v34 = vcombine.high %v880_v62, %v8277_v36  ;;  %v933_v43 = vcombine.low %v909_v39, %v925_v38  ;;  %v932_v45 = vrot.slane %v918_v40, %v7097_v18  ;;  %6536 = vmatprep.subr.bf16.mxu1 %v8279_v49 }
 0x3f8   : > { %1401 = vxpose.xlu1.b32.start.end [1/1] (short) (narrow) %v763_v47, 8  ;;  %v899_v41 = vcombine.high %v889_v35, %v8277_v36  ;;  %v900_v46 = vcombine.high %v896_v42, %v8277_v36  ;;  %6560 = vmatprep.subr.bf16.mxu0 %v8279_v49  ;;  %v970_v11 = vcombine.high %v7080_v2, %v7078_v1 }
 0x3f9   : > { %v941_v47 = vrot.slane %v933_v43, %v7102_v27  ;;  %v1037_v25 = vcombine.low %v7084_v5, %v7082_v4 }
 0x3fa   : > { %1433 = vxpose.xlu0.b32.start.end [1/1] (short) (narrow) %v760_v48, 8  ;;  %v934_v48 = vcombine.high %v909_v39, %v925_v38  ;;  %v984_v22 = vrot.slane %v970_v11, %v7097_v18 }
 0x3fb   : > { %v965_v0 = vcombine.high %v941_v47, %v8277_v36  ;;  %v1045_v31 = vrot.slane %v1037_v25, %v7097_v18 }
 0x3fc   : > { %1465 = vxpose.xlu1.b32.start.end [1/1] (short) (narrow) %v764_v51, 8  ;;  %v621_v51 = vpop.trf.xlu0  ;;  %v948_v53 = vrot.slane %v934_v48, %v7102_v27 }
 0x3fd   : > { %v985_v3 = vcombine.low %v621_v51, %v685_v50  ;;  %v986_v61 = vcombine.high %v621_v51, %v685_v50 }
 0x3fe   : > { %1497 = vxpose.xlu0.b32.start.end [1/1] (short) (narrow) %v805_v52, 8  ;;  %v916_v52 = vrot.slane %v902_v44, %v7097_v18  ;;  %v966_v56 = vcombine.high %v948_v53, %v8277_v36 }
 0x400   : > { %1529 = vxpose.xlu1.b32.start.end [1/1] (short) (narrow) %v829_v59, 8  ;;  %v949_v54 = vcombine.low %v916_v52, %v932_v45  ;;  %v950_v58 = vcombine.high %v916_v52, %v932_v45  ;;  %v993_v59 = vrot.slane %v985_v3, %v7097_v18  ;;  %v622_v21 = vpop.trf.xlu0  ;;  %v1105_v45 = vcombine.low %v7088_v10, %v7086_v9 }
 0x402   : > { %1561 = vxpose.xlu0.b32.start.end [1/1] (short) (narrow) %v812_v60, 8  ;;  %v957_v57 = vrot.slane %v949_v54, %v7102_v27  ;;  %v977_v60 = vrot.slane %v969_v55, %v7097_v18  ;;  %v1113_v51 = vrot.slane %v1105_v45, %v7097_v18  ;;  %v1106_v54 = vcombine.high %v7088_v10, %v7086_v9 }
 0x404   : > { %1593 = vxpose.xlu1.b32.start.end [1/1] (short) (narrow) %v830_v7, 8  ;;  %v967_v6 = vcombine.high %v957_v57, %v8277_v36  ;;  %v964_v7 = vrot.slane %v950_v58, %v7102_v27  ;;  %v1002_v17 = vcombine.high %v977_v60, %v993_v59 }
 0x406   : > { %1625 = vxpose.xlu0.b32.start.end [1/1] (short) (narrow) %v821_v8, 8  ;;  %v1001_v8 = vcombine.low %v977_v60, %v993_v59  ;;  %v968_v13 = vcombine.high %v964_v7, %v8277_v36  ;;  %v1016_v1 = vrot.slane %v1002_v17, %v7102_v27 }
 0x408   : > { %1657 = vxpose.xlu1.b32.start.end [1/1] (short) (narrow) %v831_v19, 8  ;;  %v1009_v14 = vrot.slane %v1001_v8, %v7102_v27  ;;  %v1000_v19 = vrot.slane %v986_v61, %v7097_v18  ;;  %v1034_v26 = vcombine.high %v1016_v1, %v8277_v36  ;;  %v1120_v61 = vrot.slane %v1106_v54, %v7097_v18 }
 0x409   : > { %v1173_v8 = vcombine.low %v7094_v16, %v7092_v15 }
 0x40a   : > { %1689 = vxpose.xlu0.b32.start.end [1/1] (short) (narrow) %v828_v20, 8  ;;  %v686_v20 = vpop.trf.xlu1  ;;  %v1017_v2 = vcombine.low %v984_v22, %v1000_v19  ;;  %v1018_v29 = vcombine.high %v984_v22, %v1000_v19 }
 0x40b   : > { %v1181_v19 = vrot.slane %v1173_v8, %v7097_v18 }
 0x40c   : > { %1721 = vxpose.xlu1.b32.start.end [1/1] (short) (narrow) %v832_v23, 8  ;;  %v1053_v23 = vcombine.low %v622_v21, %v686_v20  ;;  %v1025_v28 = vrot.slane %v1017_v2, %v7102_v27  ;;  %v1032_v63 = vrot.slane %v1018_v29, %v7102_v27 }
 0x40e   : > { %1753 = vxpose.xlu0.b32.start.end [1/1] (short) (narrow) %v873_v24, 8  ;;  %v1033_v24 = vcombine.high %v1009_v14, %v8277_v36  ;;  %v1061_v30 = vrot.slane %v1053_v23, %v7097_v18  ;;  %v687_v40 = vpop.trf.xlu1 }
 0x410   : > { %1785 = vxpose.xlu1.b32.start.end [1/1] (short) (narrow) %v897_v32, 8  ;;  %v1054_v32 = vcombine.high %v622_v21, %v686_v20  ;;  %v1069_v33 = vcombine.low %v1045_v31, %v1061_v30  ;;  %v1070_v38 = vcombine.high %v1045_v31, %v1061_v30 }
 0x412   : > { %1817 = vxpose.xlu0.b32.start.end [1/1] (short) (narrow) %v880_v62, 8  ;;  %v1035_v62 = vcombine.high %v1025_v28, %v8277_v36  ;;  %v1077_v37 = vrot.slane %v1069_v33, %v7102_v27  ;;  %v1068_v39 = vrot.slane %v1054_v32, %v7097_v18  ;;  %v688_v59 = vpop.trf.xlu1 }
 0x414   : > { %1849 = vxpose.xlu1.b32.start.end [1/1] (short) (narrow) %v898_v34, 8  ;;  %v1038_v34 = vcombine.high %v7084_v5, %v7082_v4  ;;  %v1101_v44 = vcombine.high %v1077_v37, %v8277_v36  ;;  %v1084_v4 = vrot.slane %v1070_v38, %v7102_v27  ;;  %v506_v38 = vld [vmem:[%s8269_s3 + $0x8] sm:$0xff] }
 0x416   : > { %1881 = vxpose.xlu0.b32.start.end [1/1] (short) (narrow) %v889_v35, 8  ;;  %v1036_v35 = vcombine.high %v1032_v63, %v8277_v36 }
 0x418   : > { %1913 = vxpose.xlu1.b32.start.end [1/1] (short) (narrow) %v899_v41, 8  ;;  %v623_v41 = vpop.trf.xlu0 }
 0x419   : > { %v1121_v43 = vcombine.low %v623_v41, %v687_v40  ;;  %v1122_v52 = vcombine.high %v623_v41, %v687_v40  ;;  %v514_v40 = vld [vmem:[%s8269_s3 + $0x48] sm:$0xff] }
 0x41a   : > { %1945 = vxpose.xlu0.b32.start.end [1/1] (short) (narrow) %v896_v42, 8  ;;  %v1052_v42 = vrot.slane %v1038_v34, %v7097_v18  ;;  %v505_v34 = vld [vmem:[%s8269_s3] sm:$0xff] }
 0x41b   : > { %v1129_v50 = vrot.slane %v1121_v43, %v7097_v18  ;;  %v1136_v58 = vrot.slane %v1122_v52, %v7097_v18 }
 0x41c   : > { %1977 = vxpose.xlu1.b32.start.end [1/1] (short) (narrow) %v900_v46, 8  ;;  %v1085_v5 = vcombine.low %v1052_v42, %v1068_v39  ;;  %v1102_v46 = vcombine.high %v1084_v4, %v8277_v36  ;;  %v1086_v48 = vcombine.high %v1052_v42, %v1068_v39  ;;  %v624_v60 = vpop.trf.xlu0  ;;  %v507_v42 = vld [vmem:[%s8269_s3 + $0x10] sm:$0xff] }
 0x41d   : > { %v1153_v10 = vcombine.low %v1120_v61, %v1136_v58  ;;  %v1190_v20 = vcombine.high %v624_v60, %v688_v59 }
 0x41e   : > { %2009 = vxpose.xlu0.b32.start.end [1/1] (short) (narrow) %v941_v47, 8  ;;  %v1093_v47 = vrot.slane %v1085_v5, %v7102_v27 }
 0x420   : > { %2041 = vxpose.xlu1.b32.start.end [1/1] (short) (narrow) %v965_v0, 8  ;;  %v1103_v3 = vcombine.high %v1093_v47, %v8277_v36  ;;  %v1100_v0 = vrot.slane %v1086_v48, %v7102_v27  ;;  %v516_v48 = vld [vmem:[%s8269_s3 + $0x58] sm:$0xff] }
 0x422   : > { %2073 = vxpose.xlu0.b32.start.end [1/1] (short) (narrow) %v948_v53, 8  ;;  %v1137_v53 = vcombine.low %v1113_v51, %v1129_v50  ;;  %v1104_v55 = vcombine.high %v1100_v0, %v8277_v36 }
 0x424   : > { %2105 = vxpose.xlu1.b32.start.end [1/1] (short) (narrow) %v966_v56, 8  ;;  %v1145_v56 = vrot.slane %v1137_v53, %v7102_v27 }
 0x426   : > { %2137 = vxpose.xlu0.b32.start.end [1/1] (short) (narrow) %v957_v57, 8  ;;  %v1138_v57 = vcombine.high %v1113_v51, %v1129_v50 }
 0x428   : > { %2169 = vxpose.xlu1.b32.start.end [1/1] (short) (narrow) %v967_v6, 8  ;;  %v1189_v6 = vcombine.low %v624_v60, %v688_v59  ;;  %v1152_v9 = vrot.slane %v1138_v57, %v7102_v27 }
 0x42a   : > { %2201 = vxpose.xlu0.b32.start.end [1/1] (short) (narrow) %v964_v7, 8  ;;  %v1169_v7 = vcombine.high %v1145_v56, %v8277_v36  ;;  %v1170_v11 = vcombine.high %v1152_v9, %v8277_v36  ;;  %v1197_v17 = vrot.slane %v1189_v6, %v7097_v18 }
 0x42c   : > { %2233 = vxpose.xlu1.b32.start.end [1/1] (short) (narrow) %v968_v13, 8  ;;  %v1161_v13 = vrot.slane %v1153_v10, %v7102_v27  ;;  %v1205_v23 = vcombine.low %v1181_v19, %v1197_v17  ;;  %v1206_v25 = vcombine.high %v1181_v19, %v1197_v17 }
 0x42e   : > { %2265 = vxpose.xlu0.b32.start.end [1/1] (short) (narrow) %v1009_v14, 8  ;;  %v1154_v14 = vcombine.high %v1120_v61, %v1136_v58  ;;  %v1171_v21 = vcombine.high %v1161_v13, %v8277_v36  ;;  %v1213_v2 = vrot.slane %v1205_v23, %v7102_v27  ;;  %v1220_v30 = vrot.slane %v1206_v25, %v7102_v27  ;;  %v510_v61 = vld [vmem:[%s8269_s3 + $0x28] sm:$0xff]  ;;  %v512_v25 = vld [vmem:[%s8269_s3 + $0x38] sm:$0xff] }
 0x430   : > { %2297 = vxpose.xlu1.b32.start.end [1/1] (short) (narrow) %v1033_v24, 8  ;;  %v1168_v22 = vrot.slane %v1154_v14, %v7102_v27  ;;  %v1174_v24 = vcombine.high %v7094_v16, %v7092_v15  ;;  %v1237_v29 = vcombine.high %v1213_v2, %v8277_v36  ;;  %v1238_v15 = vcombine.high %v1220_v30, %v8277_v36  ;;  %v511_v14 = vld [vmem:[%s8269_s3 + $0x30] sm:$0xff] }
 0x432   : > { %2329 = vxpose.xlu0.b32.start.end [1/1] (short) (narrow) %v1016_v1, 8  ;;  %v1172_v1 = vcombine.high %v1168_v22, %v8277_v36 }
 0x434   : > { %2361 = vxpose.xlu1.b32.start.end [1/1] (short) (narrow) %v1034_v26, 8  ;;  %v1204_v26 = vrot.slane %v1190_v20, %v7097_v18 }
 0x436   : > { %2393 = vxpose.xlu0.b32.start.end [1/1] (short) (narrow) %v1025_v28, 8  ;;  %v1188_v28 = vrot.slane %v1174_v24, %v7097_v18 }
 0x438   : > { %2425 = vxpose.xlu1.b32.start.end [1/1] (short) (narrow) %v1035_v62, 8  ;;  %v1221_v31 = vcombine.low %v1188_v28, %v1204_v26  ;;  %v1222_v32 = vcombine.high %v1188_v28, %v1204_v26  ;;  %v520_v28 = vld [vmem:[%s8269_s3 + $0x78] sm:$0xff] }
 0x43a   : > { %2457 = vxpose.xlu0.b32.start.end [1/1] (short) (narrow) %v1032_v63, 8  ;;  %v1229_v16 = vrot.slane %v1221_v31, %v7102_v27  ;;  %v1236_v63 = vrot.slane %v1222_v32, %v7102_v27 }
 0x43c   : > { %2489 = vxpose.xlu1.b32.start.end [1/1] (short) (narrow) %v1036_v35, 8  ;;  %v1239_v62 = vcombine.high %v1229_v16, %v8277_v36  ;;  %v1240_v33 = vcombine.high %v1236_v63, %v8277_v36  ;;  %v513_v35 = vld [vmem:[%s8269_s3 + $0x40] sm:$0xff]  ;;  %v540_v36 = vld [vmem:[%s8269_s3 + $0x118] sm:$0xff] }
 0x43e   : > { %2521 = vxpose.xlu0.b32.start.end [1/1] (short) (narrow) %v1077_v37, 8 }
 0x440   : > { %2553 = vxpose.xlu1.b32.start.end [1/1] (short) (narrow) %v1101_v44, 8  ;;  %v515_v44 = vld [vmem:[%s8269_s3 + $0x50] sm:$0xff] }
 0x442   : > { %2585 = vxpose.xlu0.b32.start.end [1/1] (short) (narrow) %v1084_v4, 8 }
 0x444   : > { %2617 = vxpose.xlu1.b32.start.end [1/1] (short) (narrow) %v1102_v46, 8  ;;  %v508_v46 = vld [vmem:[%s8269_s3 + $0x18] sm:$0xff] }
 0x446   : > { %2649 = vxpose.xlu0.b32.start.end [1/1] (short) (narrow) %v1093_v47, 8 }
 0x448   : > { %2681 = vxpose.xlu1.b32.start.end [1/1] (short) (narrow) %v1103_v3, 8 }
 0x44a   : > { %2713 = vxpose.xlu0.b32.start.end [1/1] (short) (narrow) %v1100_v0, 8  ;;  %v509_v0 = vld [vmem:[%s8269_s3 + $0x20] sm:$0xff] }
 0x44c   : > { %2745 = vxpose.xlu1.b32.start.end [1/1] (short) (narrow) %v1104_v55, 8 }
 0x44e   : > { %2777 = vxpose.xlu0.b32.start.end [1/1] (short) (narrow) %v1145_v56, 8  ;;  %v517_v56 = vld [vmem:[%s8269_s3 + $0x60] sm:$0xff] }
 0x450   : > { %2809 = vxpose.xlu1.b32.start.end [1/1] (short) (narrow) %v1169_v7, 8  ;;  %v518_v7 = vld [vmem:[%s8269_s3 + $0x68] sm:$0xff] }
 0x452   : > { %2841 = vxpose.xlu0.b32.start.end [1/1] (short) (narrow) %v1152_v9, 8 }
 0x454   : > { %2873 = vxpose.xlu1.b32.start.end [1/1] (short) (narrow) %v1170_v11, 8 }
 0x456   : > { %2905 = vxpose.xlu0.b32.start.end [1/1] (short) (narrow) %v1161_v13, 8 }
 0x458   : > { %2937 = vxpose.xlu1.b32.start.end [1/1] (short) (narrow) %v1171_v21, 8  ;;  %v519_v21 = vld [vmem:[%s8269_s3 + $0x70] sm:$0xff] }
 0x45a   : > { %2969 = vxpose.xlu0.b32.start.end [1/1] (short) (narrow) %v1168_v22, 8 }
 0x45c   : > { %3001 = vxpose.xlu1.b32.start.end [1/1] (short) (narrow) %v1172_v1, 8 }
 0x45e   : > { %3033 = vxpose.xlu0.b32.start.end [1/1] (short) (narrow) %v1213_v2, 8 }
 0x460   : > { %3065 = vxpose.xlu1.b32.start.end [1/1] (short) (narrow) %v1237_v29, 8 }
 0x462   : > { %3097 = vxpose.xlu0.b32.start.end [1/1] (short) (narrow) %v1220_v30, 8 }
 0x464   : > { %3129 = vxpose.xlu1.b32.start.end [1/1] (short) (narrow) %v1238_v15, 8 }
 0x466   : > { %3161 = vxpose.xlu0.b32.start.end [1/1] (short) (narrow) %v1229_v16, 8  ;;  %v521_v16 = vld [vmem:[%s8269_s3 + $0x80] sm:$0xff] }
 0x468   : > { %3193 = vxpose.xlu1.b32.start.end [1/1] (short) (narrow) %v1239_v62, 8 }
 0x46a   : > { %3225 = vxpose.xlu0.b32.start.end [1/1] (short) (narrow) %v1236_v63, 8 }
 0x46c   : > { %3257 = vxpose.xlu1.b32.start.end [1/1] (short) (narrow) %v1240_v33, 8  ;;  %v529_v33 = vld [vmem:[%s8269_s3 + $0xc0] sm:$0xff] }
 0x46e   : > { %4377 = vxpose.xlu0.b32.start [1/8] (short) (narrow) %v505_v34, 8  ;;  %v7234_v37 = vpop.trf.xlu0 }
 0x470   : > { %v7239_v39 = vpop.trf.xlu1  ;;  %4483 = vxpose.xlu1.b32.start [1/8] (short) (narrow) %v513_v35, 8 }
 0x472   : > { %4378 = vxpose.xlu0.b32.cont [2/8] (short) (narrow) %v506_v38, 8  ;;  %v7244_v41 = vpop.trf.xlu0 }
 0x473   : > { %v3289_v5 = vcombine.low %v7234_v37, %v7244_v41 }
 0x474   : > { %v7249_v43 = vpop.trf.xlu1  ;;  %4484 = vxpose.xlu1.b32.cont [2/8] (short) (narrow) %v514_v40, 8 }
 0x475   : > { %v3305_v4 = vcombine.low %v7239_v39, %v7249_v43  ;;  %v3297_v51 = vrot.slane %v3289_v5, %v7097_v18 }
 0x476   : > { %4379 = vxpose.xlu0.b32.cont [3/8] (short) (narrow) %v507_v42, 8  ;;  %v7258_v45 = vpop.trf.xlu0  ;;  %v522_v42 = vld [vmem:[%s8269_s3 + $0x88] sm:$0xff] }
 0x477   : > { %v3313_v50 = vrot.slane %v3305_v4, %v7097_v18  ;;  %v530_v4 = vld [vmem:[%s8269_s3 + $0xc8] sm:$0xff] }
 0x478   : > { %v7263_v47 = vpop.trf.xlu1  ;;  %4485 = vxpose.xlu1.b32.cont [3/8] (short) (narrow) %v515_v44, 8 }
 0x479   : > { %v3353_v58 = vcombine.low %v3297_v51, %v3313_v50  ;;  %v3354_v59 = vcombine.high %v3297_v51, %v3313_v50 }
 0x47a   : > { %4380 = vxpose.xlu0.b32.cont [4/8] (short) (narrow) %v508_v46, 8  ;;  %v7270_v52 = vpop.trf.xlu0 }
 0x47b   : > { %v3321_v3 = vcombine.low %v7258_v45, %v7270_v52  ;;  %v7303_v11 = vrot.slane %v3353_v58, %v7102_v27  ;;  %v7306_v13 = vrot.slane %v3354_v59, %v7102_v27  ;;  %v531_v59 = vld [vmem:[%s8269_s3 + $0xd0] sm:$0xff] }
 0x47c   : > { %v7279_v53 = vpop.trf.xlu1  ;;  %4486 = vxpose.xlu1.b32.cont [4/8] (short) (narrow) %v516_v48, 8 }
 0x47d   : > { %v3337_v54 = vcombine.low %v7263_v47, %v7279_v53  ;;  %v3329_v55 = vrot.slane %v3321_v3, %v7097_v18  ;;  %v523_v3 = vld [vmem:[%s8269_s3 + $0x90] sm:$0xff] }
 0x47e   : > { %4381 = vxpose.xlu0.b32.cont [5/8] (short) (narrow) %v509_v0, 8  ;;  %v7289_v57 = vpop.trf.xlu0 }
 0x47f   : > { %v3345_v60 = vrot.slane %v3337_v54, %v7097_v18 }
 0x480   : > { %v7295_v6 = vpop.trf.xlu1  ;;  %4487 = vxpose.xlu1.b32.cont [5/8] (short) (narrow) %v517_v56, 8 }
 0x481   : > { %v3385_v9 = vcombine.low %v3329_v55, %v3345_v60  ;;  %v3386_v10 = vcombine.high %v3329_v55, %v3345_v60 }
 0x482   : > { %4382 = vxpose.xlu0.b32.cont [6/8] (short) (narrow) %v510_v61, 8  ;;  %v7300_v8 = vpop.trf.xlu0 }
 0x483   : > { %v3393_v19 = vrot.slane %v3385_v9, %v7102_v27  ;;  %v3400_v20 = vrot.slane %v3386_v10, %v7102_v27  ;;  %v3425_v23 = vcombine.low %v7289_v57, %v7300_v8 }
 0x484   : > { %v7311_v17 = vpop.trf.xlu1  ;;  %4488 = vxpose.xlu1.b32.cont [6/8] (short) (narrow) %v518_v7, 8 }
 0x485   : > { %v3441_v22 = vcombine.low %v7295_v6, %v7311_v17  ;;  %v3418_v1 = vcombine.high %v7303_v11, %v3393_v19  ;;  %v3420_v2 = vcombine.high %v7306_v13, %v3400_v20  ;;  %v3433_v30 = vrot.slane %v3425_v23, %v7097_v18 }
 0x486   : > { %4383 = vxpose.xlu0.b32.cont [7/8] (short) (narrow) %v511_v14, 8  ;;  %v7322_v24 = vpop.trf.xlu0  ;;  %v3417_v60 = vcombine.low %v7303_v11, %v3393_v19  ;;  %v3419_v61 = vcombine.low %v7306_v13, %v3400_v20  ;;  %v532_v13 = vld [vmem:[%s8269_s3 + $0xd8] sm:$0xff] }
 0x487   : > { %v3449_v29 = vrot.slane %v3441_v22, %v7097_v18 }
 0x488   : > { %v7329_v26 = vpop.trf.xlu1  ;;  %4489 = vxpose.xlu1.b32.cont [7/8] (short) (narrow) %v519_v21, 8 }
 0x489   : > { %v3489_v35 = vcombine.low %v3433_v30, %v3449_v29  ;;  %v3490_v38 = vcombine.high %v3433_v30, %v3449_v29 }
 0x48a   : > { %4384 = vxpose.xlu0.b32.end [8/8] (short) (narrow) %v512_v25, 8  ;;  %v7336_v31 = vpop.trf.xlu0 }
 0x48b   : > { %v3457_v15 = vcombine.low %v7322_v24, %v7336_v31  ;;  %v3497_v50 = vrot.slane %v3489_v35, %v7102_v27  ;;  %v3504_v51 = vrot.slane %v3490_v38, %v7102_v27 }
 0x48c   : > { %v7343_v32 = vpop.trf.xlu1  ;;  %4490 = vxpose.xlu1.b32.end [8/8] (short) (narrow) %v520_v28, 8  ;;  %v524_v28 = vld [vmem:[%s8269_s3 + $0x98] sm:$0xff] }
 0x48d   : > { %v3473_v62 = vcombine.low %v7329_v26, %v7343_v32  ;;  %v3465_v63 = vrot.slane %v3457_v15, %v7097_v18 }
 0x48e   : > { %4588 = vxpose.xlu0.b32.start [1/8] (short) (narrow) %v521_v16, 8  ;;  %v7351_v34 = vpop.trf.xlu0 }
 0x48f   : > { %v3481_v40 = vrot.slane %v3473_v62, %v7097_v18 }
 0x490   : > { %v7357_v44 = vpop.trf.xlu1  ;;  %4693 = vxpose.xlu1.b32.start [1/8] (short) (narrow) %v529_v33, 8  ;;  %v533_v33 = vld [vmem:[%s8269_s3 + $0xe0] sm:$0xff] }
 0x491   : > { %v3521_v5 = vcombine.low %v3465_v63, %v3481_v40  ;;  %v3522_v46 = vcombine.high %v3465_v63, %v3481_v40 }
 0x492   : > { %4589 = vxpose.xlu0.b32.cont [2/8] (short) (narrow) %v522_v42, 8  ;;  %v7362_v48 = vpop.trf.xlu0 }
 0x493   : > { %v3529_v54 = vrot.slane %v3521_v5, %v7102_v27  ;;  %v3536_v55 = vrot.slane %v3522_v46, %v7102_v27  ;;  %v3561_v58 = vcombine.low %v7351_v34, %v7362_v48  ;;  %v526_v5 = vld [vmem:[%s8269_s3 + $0xa8] sm:$0xff] }
 0x494   : > { %v7369_v0 = vpop.trf.xlu1  ;;  %4694 = vxpose.xlu1.b32.cont [2/8] (short) (narrow) %v530_v4, 8 }
 0x495   : > { %v3577_v56 = vcombine.low %v7357_v44, %v7369_v0  ;;  %v3553_v9 = vcombine.low %v3497_v50, %v3529_v54  ;;  %v3554_v10 = vcombine.high %v3497_v50, %v3529_v54  ;;  %v3555_v14 = vcombine.low %v3504_v51, %v3536_v55 }
 0x496   : > { %4590 = vxpose.xlu0.b32.cont [3/8] (short) (narrow) %v523_v3, 8  ;;  %v7382_v7 = vpop.trf.xlu0  ;;  %v3556_v21 = vcombine.high %v3504_v51, %v3536_v55  ;;  %v3569_v20 = vrot.slane %v3561_v58, %v7097_v18  ;;  %v534_v51 = vld [vmem:[%s8269_s3 + $0xe8] sm:$0xff]  ;;  %v3562_v3 = vcombine.high %v7351_v34, %v7362_v48  ;;  %v3578_v58 = vcombine.high %v7357_v44, %v7369_v0  ;;  %v535_v44 = vld [vmem:[%s8269_s3 + $0xf0] sm:$0xff] }
 0x497   : > { %v6537_v23 = vpack.c.bf16 %v3553_v9, %v3417_v60  ;;  %v6561_v25 = vpack.c.bf16 %v3555_v14, %v3419_v61  ;;  %v7387_v29 = vpack.c.bf16 %v3554_v10, %v3418_v1  ;;  %v3585_v19 = vrot.slane %v3577_v56, %v7097_v18  ;;  %v527_v9 = vld [vmem:[%s8269_s3 + $0xb0] sm:$0xff] }
 0x498   : > { %v1929_v22 = vpop.trf.xlu1  ;;  %4695 = vxpose.xlu1.b32.cont [3/8] (short) (narrow) %v531_v59, 8  ;;  %v7389_v11 = vpack.c.bf16 %v3556_v21, %v3420_v2  ;;  %v525_v2 = vld [vmem:[%s8269_s3 + $0xa0] sm:$0xff]  ;;  %v3576_v0 = vrot.slane %v3562_v3, %v7097_v18 }
 0x499   : > { %6538 = vmatpush3.bf16.msra.mxu1 %v6537_v23  ;;  %6562 = vmatpush3.bf16.msra.mxu0 %v6561_v25  ;;  %v3625_v35 = vcombine.low %v3569_v20, %v3585_v19  ;;  %v3626_v38 = vcombine.high %v3569_v20, %v3585_v19 }
 0x49a   : > { %v1961_v30 = vpop.trf.xlu0  ;;  %4591 = vxpose.xlu0.b32.cont [4/8] (short) (narrow) %v524_v28, 8  ;;  %6539 = vmatprep.subr.bf16.mxu1 %v8279_v49  ;;  %v3592_v28 = vrot.slane %v3578_v58, %v7097_v18 }
 0x49b   : > { %v3593_v15 = vcombine.low %v7382_v7, %v1961_v30  ;;  %v3594_v16 = vcombine.high %v7382_v7, %v1961_v30  ;;  %6563 = vmatprep.subr.bf16.mxu0 %v8279_v49  ;;  %v7417_v55 = vrot.slane %v3625_v35, %v7102_v27  ;;  %v7420_v56 = vrot.slane %v3626_v38, %v7102_v27 }
 0x49c   : > { %v1993_v1 = vpop.trf.xlu1  ;;  %4696 = vxpose.xlu1.b32.cont [4/8] (short) (narrow) %v532_v13, 8  ;;  %v3641_v35 = vcombine.low %v3576_v0, %v3592_v28  ;;  %v3642_v58 = vcombine.high %v3576_v0, %v3592_v28  ;;  %v538_v28 = vld [vmem:[%s8269_s3 + $0x108] sm:$0xff] }
 0x49d   : > { %v3609_v62 = vcombine.low %v1929_v22, %v1993_v1  ;;  %v3601_v63 = vrot.slane %v3593_v15, %v7097_v18  ;;  %v3610_v59 = vcombine.high %v1929_v22, %v1993_v1  ;;  %v3608_v19 = vrot.slane %v3594_v16, %v7097_v18  ;;  %v536_v16 = vld [vmem:[%s8269_s3 + $0xf8] sm:$0xff] }
 0x49e   : > { %v2025_v40 = vpop.trf.xlu0  ;;  %4592 = vxpose.xlu0.b32.cont [5/8] (short) (narrow) %v525_v2, 8  ;;  %v528_v2 = vld [vmem:[%s8269_s3 + $0xb8] sm:$0xff] }
 0x49f   : > { %v3617_v42 = vrot.slane %v3609_v62, %v7097_v18  ;;  %v3624_v13 = vrot.slane %v3610_v59, %v7097_v18 }
 0x4a0   : > { %v2057_v4 = vpop.trf.xlu1  ;;  %4697 = vxpose.xlu1.b32.cont [5/8] (short) (narrow) %v533_v33, 8 }
 0x4a1   : > { %v3657_v46 = vcombine.low %v3601_v63, %v3617_v42  ;;  %v3658_v50 = vcombine.high %v3601_v63, %v3617_v42  ;;  %v3673_v38 = vcombine.low %v3608_v19, %v3624_v13  ;;  %v3674_v59 = vcombine.high %v3608_v19, %v3624_v13 }
 0x4a2   : > { %v2089_v54 = vpop.trf.xlu0  ;;  %4593 = vxpose.xlu0.b32.cont [6/8] (short) (narrow) %v526_v5, 8 }
 0x4a3   : > { %v7425_v60 = vrot.slane %v3657_v46, %v7102_v27  ;;  %v7428_v61 = vrot.slane %v3658_v50, %v7102_v27  ;;  %v3697_v34 = vcombine.low %v2025_v40, %v2089_v54  ;;  %v3698_v48 = vcombine.high %v2025_v40, %v2089_v54  ;;  %v537_v50 = vld [vmem:[%s8269_s3 + $0x100] sm:$0xff] }
 0x4a4   : > { %v2121_v7 = vpop.trf.xlu1  ;;  %4698 = vxpose.xlu1.b32.cont [6/8] (short) (narrow) %v534_v51, 8  ;;  %v545_v54 = vld [vmem:[%s8269_s3 + $0x140] sm:$0xff] }
 0x4a5   : > { %v3713_v10 = vcombine.low %v2057_v4, %v2121_v7  ;;  %v3714_v14 = vcombine.high %v2057_v4, %v2121_v7  ;;  %v7438_v21 = vrot.slane %v3698_v48, %v7097_v18  ;;  %v3690_v23 = vcombine.high %v7417_v55, %v7425_v60 }
 0x4a6   : > { %v2153_v22 = vpop.trf.xlu0  ;;  %v3692_v25 = vcombine.high %v7420_v56, %v7428_v61  ;;  %4594 = vxpose.xlu0.b32.cont [7/8] (short) (narrow) %v527_v9, 8  ;;  %v3705_v15 = vrot.slane %v3697_v34, %v7097_v18 }
 0x4a7   : > { %v3728_v20 = vrot.slane %v3714_v14, %v7097_v18  ;;  %v3721_v30 = vrot.slane %v3713_v10, %v7097_v18  ;;  %v3649_v14 = vrot.slane %v3641_v35, %v7102_v27 }
 0x4a8   : > { %v2185_v1 = vpop.trf.xlu1  ;;  %4699 = vxpose.xlu1.b32.cont [7/8] (short) (narrow) %v535_v44, 8  ;;  %v3681_v44 = vrot.slane %v3673_v38, %v7102_v27  ;;  %v3689_v38 = vcombine.low %v7417_v55, %v7425_v60 }
 0x4a9   : > { %v3777_v62 = vcombine.low %v7438_v21, %v3728_v20  ;;  %v3778_v63 = vcombine.high %v7438_v21, %v3728_v20  ;;  %v3761_v40 = vcombine.low %v3705_v15, %v3721_v30  ;;  %v3762_v42 = vcombine.high %v3705_v15, %v3721_v30  ;;  %v546_v15 = vld [vmem:[%s8269_s3 + $0x148] sm:$0xff] }
 0x4aa   : > { %v2217_v33 = vpop.trf.xlu0  ;;  %4595 = vxpose.xlu0.b32.end [8/8] (short) (narrow) %v528_v2, 8  ;;  %v7486_v2 = vrot.slane %v3674_v59, %v7102_v27 }
 0x4ab   : > { %v3729_v5 = vcombine.low %v2153_v22, %v2217_v33  ;;  %v3730_v46 = vcombine.high %v2153_v22, %v2217_v33  ;;  %v3769_v21 = vrot.slane %v3761_v40, %v7102_v27  ;;  %v3776_v0 = vrot.slane %v3762_v42, %v7102_v27 }
 0x4ac   : > { %v2249_v4 = vpop.trf.xlu1  ;;  %4700 = vxpose.xlu1.b32.end [8/8] (short) (narrow) %v536_v16, 8  ;;  %v3691_v40 = vcombine.low %v7420_v56, %v7428_v61  ;;  %v3785_v42 = vrot.slane %v3777_v62, %v7102_v27  ;;  %v547_v62 = vld [vmem:[%s8269_s3 + $0x150] sm:$0xff] }
 0x4ad   : > { %v3745_v51 = vcombine.low %v2185_v1, %v2249_v4  ;;  %v3746_v3 = vcombine.high %v2185_v1, %v2249_v4  ;;  %v3737_v7 = vrot.slane %v3729_v5, %v7097_v18  ;;  %v3744_v34 = vrot.slane %v3730_v46, %v7097_v18 }
 0x4ae   : > { %v7466_v48 = vpop.trf.xlu0  ;;  %4798 = vxpose.xlu0.b32.start [1/8] (short) (narrow) %v537_v50, 8  ;;  %v7483_v1 = vrot.slane %v3642_v58, %v7102_v27  ;;  %v539_v50 = vld [vmem:[%s8269_s3 + $0x110] sm:$0xff] }
 0x4af   : > { %v3753_v9 = vrot.slane %v3745_v51, %v7097_v18  ;;  %v3760_v10 = vrot.slane %v3746_v3, %v7097_v18  ;;  %v3693_v51 = vcombine.low %v3649_v14, %v3681_v44  ;;  %v3792_v3 = vrot.slane %v3778_v63, %v7102_v27 }
 0x4b0   : > { %v7474_v22 = vpop.trf.xlu1  ;;  %4903 = vxpose.xlu1.b32.start [1/8] (short) (narrow) %v545_v54, 8 }
 0x4b1   : > { %v3793_v13 = vcombine.low %v3737_v7, %v3753_v9  ;;  %v3794_v19 = vcombine.high %v3737_v7, %v3753_v9  ;;  %v3809_v20 = vcombine.low %v3744_v34, %v3760_v10  ;;  %v3810_v30 = vcombine.high %v3744_v34, %v3760_v10 }
 0x4b2   : > { %v7488_v16 = vpop.trf.xlu0  ;;  %4799 = vxpose.xlu0.b32.cont [2/8] (short) (narrow) %v538_v28, 8 }
 0x4b3   : > { %v3801_v33 = vrot.slane %v3793_v13, %v7102_v27  ;;  %v3808_v35 = vrot.slane %v3794_v19, %v7102_v27  ;;  %v3817_v4 = vrot.slane %v3809_v20, %v7102_v27  ;;  %v3834_v46 = vcombine.high %v7466_v48, %v7488_v16 }
 0x4b4   : > { %v7498_v5 = vpop.trf.xlu1  ;;  %4904 = vxpose.xlu1.b32.cont [2/8] (short) (narrow) %v546_v15, 8  ;;  %v3824_v7 = vrot.slane %v3810_v30, %v7102_v27  ;;  %v3694_v20 = vcombine.high %v3649_v14, %v3681_v44 }
 0x4b5   : > { %v3850_v54 = vcombine.high %v7474_v22, %v7498_v5  ;;  %v3825_v58 = vcombine.low %v3769_v21, %v3801_v33  ;;  %v3827_v59 = vcombine.low %v3776_v0, %v3808_v35  ;;  %v3848_v34 = vrot.slane %v3834_v46, %v7097_v18  ;;  %v549_v46 = vld [vmem:[%s8269_s3 + $0x160] sm:$0xff] }
 0x4b6   : > { %v7513_v9 = vpop.trf.xlu0  ;;  %v3826_v10 = vcombine.high %v3769_v21, %v3801_v33  ;;  %v3828_v28 = vcombine.high %v3776_v0, %v3808_v35  ;;  %4800 = vxpose.xlu0.b32.cont [3/8] (short) (narrow) %v539_v50, 8  ;;  %v3829_v0 = vcombine.low %v3785_v42, %v3817_v4  ;;  %v3830_v33 = vcombine.high %v3785_v42, %v3817_v4  ;;  %v548_v35 = vld [vmem:[%s8269_s3 + $0x158] sm:$0xff] }
 0x4b7   : > { %v3864_v13 = vrot.slane %v3850_v54, %v7097_v18  ;;  %v6540_v63 = vpack.c.bf16 %v3825_v58, %v3689_v38  ;;  %v6564_v19 = vpack.c.bf16 %v3827_v59, %v3691_v40  ;;  %v3695_v38 = vcombine.low %v7483_v1, %v7486_v2  ;;  %v541_v40 = vld [vmem:[%s8269_s3 + $0x120] sm:$0xff] }
 0x4b8   : > { %v7516_v15 = vpop.trf.xlu1  ;;  %4905 = vxpose.xlu1.b32.cont [3/8] (short) (narrow) %v547_v62, 8  ;;  %v7524_v30 = vpack.c.bf16 %v3826_v10, %v3690_v23  ;;  %v7529_v21 = vpack.c.bf16 %v3828_v28, %v3692_v25  ;;  %v7537_v60 = vpack.c.bf16 %v3829_v0, %v3693_v51  ;;  %v7539_v56 = vpack.c.bf16 %v3830_v33, %v3694_v20 }
 0x4b9   : > { %v3913_v14 = vcombine.low %v3848_v34, %v3864_v13  ;;  %v3914_v44 = vcombine.high %v3848_v34, %v3864_v13  ;;  %6541 = vmatpush3.bf16.msra.mxu1 %v6540_v63  ;;  %6565 = vmatpush3.bf16.msra.mxu0 %v6564_v19  ;;  %v3831_v61 = vcombine.low %v3792_v3, %v3824_v7  ;;  %v542_v34 = vld [vmem:[%s8269_s3 + $0x128] sm:$0xff] }
 0x4ba   : > { %v2473_v55 = vpop.trf.xlu0  ;;  %6542 = vmatprep.subr.bf16.mxu1 %v8279_v49  ;;  %8289 = vst [vmem:[#allocation10_spill] sm:$0xff] %v7537_v60  ;;  %8290 = vst [vmem:[#allocation11_spill] sm:$0xff] %v7539_v56  ;;  %4801 = vxpose.xlu0.b32.cont [4/8] (short) (narrow) %v540_v36, 8  ;;  %v3696_v36 = vcombine.high %v7483_v1, %v7486_v2  ;;  %v3832_v50 = vcombine.high %v3792_v3, %v3824_v7  ;;  %v550_v1 = vld [vmem:[%s8269_s3 + $0x168] sm:$0xff] }
 0x4bb   : > { %v3866_v25 = vcombine.high %v7513_v9, %v2473_v55  ;;  %6566 = vmatprep.subr.bf16.mxu0 %v8279_v49  ;;  %v7546_v42 = vpack.c.bf16 %v3831_v61, %v3695_v38  ;;  %v3849_v2 = vcombine.low %v7474_v22, %v7498_v5  ;;  %v3833_v3 = vcombine.low %v7466_v48, %v7488_v16 }
 0x4bc   : > { %v2505_v23 = vpop.trf.xlu1  ;;  %4906 = vxpose.xlu1.b32.cont [4/8] (short) (narrow) %v548_v35, 8  ;;  %v7556_v58 = vpack.c.bf16 %v3832_v50, %v3696_v36  ;;  %v3865_v7 = vcombine.low %v7513_v9, %v2473_v55  ;;  %v7570_v63 = vrot.slane %v3913_v14, %v7102_v27  ;;  %v7577_v0 = vrot.slane %v3914_v44, %v7102_v27  ;;  %v543_v9 = vld [vmem:[%s8269_s3 + $0x130] sm:$0xff] }
 0x4bd   : > { %8291 = vst [vmem:[#allocation12_spill] sm:$0xff] %v7546_v42  ;;  %v3882_v4 = vcombine.high %v7516_v15, %v2505_v23  ;;  %v3880_v51 = vrot.slane %v3866_v25, %v7097_v18  ;;  %v3881_v19 = vcombine.low %v7516_v15, %v2505_v23  ;;  %v551_v14 = vld [vmem:[%s8269_s3 + $0x170] sm:$0xff]  ;;  %v3857_v44 = vrot.slane %v3849_v2, %v7097_v18 }
 0x4be   : > { %v2537_v54 = vpop.trf.xlu0  ;;  %4802 = vxpose.xlu0.b32.cont [5/8] (short) (narrow) %v541_v40, 8  ;;  %8292 = vst [vmem:[#allocation13_spill] sm:$0xff] %v7556_v58  ;;  %v3841_v35 = vrot.slane %v3833_v3, %v7097_v18  ;;  %v3873_v38 = vrot.slane %v3865_v7, %v7097_v18 }
 0x4bf   : > { %v3896_v62 = vrot.slane %v3882_v4, %v7097_v18  ;;  %v3889_v23 = vrot.slane %v3881_v19, %v7097_v18 }
 0x4c0   : > { %v2569_v59 = vpop.trf.xlu1  ;;  %4907 = vxpose.xlu1.b32.cont [5/8] (short) (narrow) %v549_v46, 8  ;;  %v3898_v2 = vcombine.high %v3841_v35, %v3857_v44 }
 0x4c1   : > { %v3945_v10 = vcombine.low %v3880_v51, %v3896_v62  ;;  %v3946_v28 = vcombine.high %v3880_v51, %v3896_v62  ;;  %v544_v51 = vld [vmem:[%s8269_s3 + $0x138] sm:$0xff]  ;;  %v3929_v3 = vcombine.low %v3873_v38, %v3889_v23  ;;  %v3930_v7 = vcombine.high %v3873_v38, %v3889_v23 }
 0x4c2   : > { %v2601_v13 = vpop.trf.xlu0  ;;  %4803 = vxpose.xlu0.b32.cont [6/8] (short) (narrow) %v542_v34, 8 }
 0x4c3   : > { %v7574_v20 = vrot.slane %v3945_v10, %v7102_v27  ;;  %v7580_v22 = vrot.slane %v3946_v28, %v7102_v27  ;;  %v3969_v48 = vcombine.low %v2537_v54, %v2601_v13  ;;  %v3970_v16 = vcombine.high %v2537_v54, %v2601_v13  ;;  %v552_v10 = vld [vmem:[%s8269_s3 + $0x178] sm:$0xff] }
 0x4c4   : > { %v2633_v5 = vpop.trf.xlu1  ;;  %4908 = vxpose.xlu1.b32.cont [6/8] (short) (narrow) %v550_v1, 8  ;;  %v3897_v1 = vcombine.low %v3841_v35, %v3857_v44 }
 0x4c5   : > { %v3985_v33 = vcombine.low %v2569_v59, %v2633_v5  ;;  %v3986_v15 = vcombine.high %v2569_v59, %v2633_v5  ;;  %v7592_v55 = vrot.slane %v3970_v16, %v7097_v18  ;;  %v3977_v36 = vrot.slane %v3969_v48, %v7097_v18 }
 0x4c6   : > { %v2665_v61 = vpop.trf.xlu0  ;;  %4804 = vxpose.xlu0.b32.cont [7/8] (short) (narrow) %v543_v9, 8  ;;  %v553_v9 = vld [vmem:[%s8269_s3 + $0x180] sm:$0xff] }
 0x4c7   : > { %v7596_v25 = vrot.slane %v3986_v15, %v7097_v18  ;;  %v3993_v46 = vrot.slane %v3985_v33, %v7097_v18 }
 0x4c8   : > { %v2697_v50 = vpop.trf.xlu1  ;;  %4909 = vxpose.xlu1.b32.cont [7/8] (short) (narrow) %v551_v14, 8  ;;  %v561_v14 = vld [vmem:[%s8269_s3 + $0x1c0] sm:$0xff] }
 0x4c9   : > { %v4049_v59 = vcombine.low %v7592_v55, %v7596_v25  ;;  %v4050_v34 = vcombine.high %v7592_v55, %v7596_v25  ;;  %v4033_v13 = vcombine.low %v3977_v36, %v3993_v46  ;;  %v4034_v19 = vcombine.high %v3977_v36, %v3993_v46 }
 0x4ca   : > { %v2729_v28 = vpop.trf.xlu0  ;;  %4805 = vxpose.xlu0.b32.end [8/8] (short) (narrow) %v544_v51, 8  ;;  %v7629_v55 = vrot.slane %v3897_v1, %v7102_v27  ;;  %v7637_v46 = vrot.slane %v3929_v3, %v7102_v27  ;;  %v7640_v36 = vrot.slane %v3930_v7, %v7102_v27  ;;  %v562_v7 = vld [vmem:[%s8269_s3 + $0x1c8] sm:$0xff] }
 0x4cb   : > { %v4001_v48 = vcombine.low %v2665_v61, %v2729_v28  ;;  %v4002_v16 = vcombine.high %v2665_v61, %v2729_v28  ;;  %v7632_v61 = vrot.slane %v3898_v2, %v7102_v27  ;;  %v7646_v51 = vrot.slane %v4034_v19, %v7102_v27  ;;  %v554_v28 = vld [vmem:[%s8269_s3 + $0x188] sm:$0xff] }
 0x4cc   : > { %v2761_v5 = vpop.trf.xlu1  ;;  %4910 = vxpose.xlu1.b32.end [8/8] (short) (narrow) %v552_v10, 8 }
 0x4cd   : > { %v4017_v33 = vcombine.low %v2697_v50, %v2761_v5  ;;  %v4018_v15 = vcombine.high %v2697_v50, %v2761_v5  ;;  %v4009_v44 = vrot.slane %v4001_v48, %v7097_v18  ;;  %v4016_v35 = vrot.slane %v4002_v16, %v7097_v18 }
 0x4ce   : > { %v7626_v38 = vpop.trf.xlu0  ;;  %5008 = vxpose.xlu0.b32.start [1/8] (short) (narrow) %v553_v9, 8  ;;  %v7643_v50 = vrot.slane %v4033_v13, %v7102_v27  ;;  %v4057_v16 = vrot.slane %v4049_v59, %v7102_v27  ;;  %v563_v59 = vld [vmem:[%s8269_s3 + $0x1d0] sm:$0xff] }
 0x4cf   : > { %v4025_v23 = vrot.slane %v4017_v33, %v7097_v18  ;;  %v4032_v25 = vrot.slane %v4018_v15, %v7097_v18 }
 0x4d0   : > { %v7648_v10 = vpop.trf.xlu1  ;;  %5113 = vxpose.xlu1.b32.start [1/8] (short) (narrow) %v561_v14, 8  ;;  %v555_v14 = vld [vmem:[%s8269_s3 + $0x190] sm:$0xff] }
 0x4d1   : > { %v4065_v1 = vcombine.low %v4009_v44, %v4025_v23  ;;  %v4066_v2 = vcombine.high %v4009_v44, %v4025_v23  ;;  %v4081_v3 = vcombine.low %v4016_v35, %v4032_v25  ;;  %v4082_v5 = vcombine.high %v4016_v35, %v4032_v25 }
 0x4d2   : > { %v7656_v13 = vpop.trf.xlu0  ;;  %5009 = vxpose.xlu0.b32.cont [2/8] (short) (narrow) %v554_v28, 8  ;;  %v3961_v44 = vcombine.low %v7629_v55, %v7637_v46  ;;  %v3963_v25 = vcombine.low %v7632_v61, %v7640_v36 }
 0x4d3   : > { %v7659_v19 = vrot.slane %v4065_v1, %v7102_v27  ;;  %v7662_v48 = vrot.slane %v4066_v2, %v7102_v27  ;;  %v4089_v9 = vrot.slane %v4081_v3, %v7102_v27  ;;  %v4106_v15 = vcombine.high %v7626_v38, %v7656_v13 }
 0x4d4   : > { %v2889_v33 = vpop.trf.xlu1  ;;  %5114 = vxpose.xlu1.b32.cont [2/8] (short) (narrow) %v562_v7, 8  ;;  %v4064_v1 = vrot.slane %v4050_v34, %v7102_v27  ;;  %v4096_v2 = vrot.slane %v4082_v5, %v7102_v27  ;;  %v556_v34 = vld [vmem:[%s8269_s3 + $0x198] sm:$0xff] }
 0x4d5   : > { %v4122_v35 = vcombine.high %v7648_v10, %v2889_v33  ;;  %v4097_v23 = vcombine.low %v7643_v50, %v7659_v19  ;;  %v4099_v28 = vcombine.low %v7646_v51, %v7662_v48  ;;  %v7686_v3 = vrot.slane %v4106_v15, %v7097_v18  ;;  %v560_v15 = vld [vmem:[%s8269_s3 + $0x1b8] sm:$0xff] }
 0x4d6   : > { %v7688_v7 = vpop.trf.xlu0  ;;  %5010 = vxpose.xlu0.b32.cont [3/8] (short) (narrow) %v555_v14, 8  ;;  %v4101_v49 = vcombine.low %v4057_v16, %v4089_v9  ;;  %v4102_v5 = vcombine.high %v4057_v16, %v4089_v9  ;;  %v564_v14 = vld [vmem:[%s8269_s3 + $0x1d8] sm:$0xff]  ;;  %v8296_v9 = vcombine.high %v7570_v63, %v7574_v20 }
 0x4d7   : > { %v7691_v62 = vrot.slane %v4122_v35, %v7097_v18  ;;  %v6543_v54 = vpack.c.bf16 %v4097_v23, %v3961_v44  ;;  %v6567_v4 = vpack.c.bf16 %v4099_v28, %v3963_v25  ;;  %v8293_v35 = vmov 0.0|0.0  }
 0x4d8   : > { %v7693_v40 = vpop.trf.xlu1  ;;  %5115 = vxpose.xlu1.b32.cont [3/8] (short) (narrow) %v563_v59, 8  ;;  %v8294_v59 = vcombine.low %v7570_v63, %v7574_v20  ;;  %v7716_v23 = vpack.c.bf16 %v4102_v5, %v8296_v9  ;;  %v565_v63 = vld [vmem:[%s8269_s3 + $0x1e0] sm:$0xff]  ;;  %v4104_v20 = vcombine.high %v4064_v1, %v4096_v2  ;;  %v8300_v5 = vcombine.high %v7577_v0, %v7580_v22  ;;  %v558_v9 = vld [vmem:[%s8269_s3 + $0x1a8] sm:$0xff] }
 0x4d9   : > { %6544 = vmatpush3.bf16.msra.mxu1 %v6543_v54  ;;  %6568 = vmatpush3.bf16.msra.mxu0 %v6567_v4  ;;  %v4103_v54 = vcombine.low %v4064_v1, %v4096_v2  ;;  %v557_v4 = vld [vmem:[%s8269_s3 + $0x1a0] sm:$0xff]  ;;  %v4121_v2 = vcombine.low %v7648_v10, %v2889_v33 }
 0x4da   : > { %v7705_v44 = vpop.trf.xlu0  ;;  %6545 = vmatprep.subr.bf16.mxu1 %v8293_v35  ;;  %v7711_v16 = vpack.c.bf16 %v4101_v49, %v8294_v59  ;;  %8297 = vst [vmem:[#allocation15_spill] sm:$0xff] %v7716_v23  ;;  %5011 = vxpose.xlu0.b32.cont [4/8] (short) (narrow) %v556_v34, 8  ;;  %v8298_v49 = vcombine.low %v7577_v0, %v7580_v22 }
 0x4db   : > { %6569 = vmatprep.subr.bf16.mxu0 %v8293_v35  ;;  %v4105_v0 = vcombine.low %v7626_v38, %v7656_v13  ;;  %v567_v13 = vld [vmem:[%s8269_s3 + $0x1f0] sm:$0xff] }
 0x4dc   : > { %8295 = vst [vmem:[#allocation14_spill] sm:$0xff] %v7711_v16  ;;  %v7718_v25 = vpop.trf.xlu1  ;;  %5116 = vxpose.xlu1.b32.cont [4/8] (short) (narrow) %v564_v14, 8  ;;  %v7727_v28 = vpack.c.bf16 %v4103_v54, %v8298_v49  ;;  %v7737_v14 = vpack.c.bf16 %v4104_v20, %v8300_v5  ;;  %v566_v54 = vld [vmem:[%s8269_s3 + $0x1e8] sm:$0xff]  ;;  %v4129_v20 = vrot.slane %v4121_v2, %v7097_v18  ;;  %v568_v2 = vld [vmem:[%s8269_s3 + $0x1f8] sm:$0xff] }
 0x4dd   : > { %v4153_v22 = vcombine.low %v7693_v40, %v7718_v25  ;;  %v4113_v5 = vrot.slane %v4105_v0, %v7097_v18 }
 0x4de   : > { %8299 = vst [vmem:[#allocation16_spill] sm:$0xff] %v7727_v28  ;;  %v7732_v34 = vpop.trf.xlu0  ;;  %5012 = vxpose.xlu0.b32.cont [5/8] (short) (narrow) %v557_v4, 8  ;;  %8301 = vst [vmem:[#allocation17_spill] sm:$0xff] %v7737_v14  ;;  %v4137_v4 = vcombine.low %v7688_v7, %v7705_v44 }
 0x4e0   : > { %5117 = vxpose.xlu1.b32.cont [5/8] (short) (narrow) %v565_v63, 8  ;;  %v7739_v59 = vpop.trf.xlu1  ;;  %v559_v63 = vld [vmem:[%s8269_s3 + $0x1b0] sm:$0xff] }
 0x4e2   : > { %v7747_v1 = vpop.trf.xlu0  ;;  %5013 = vxpose.xlu0.b32.cont [6/8] (short) (narrow) %v558_v9, 8  ;;  %v4161_v9 = vrot.slane %v4153_v22, %v7097_v18  ;;  %v4169_v22 = vcombine.low %v4113_v5, %v4129_v20 }
 0x4e3   : > { %v4241_v38 = vcombine.low %v7732_v34, %v7747_v1 }
 0x4e4   : > { %5118 = vxpose.xlu1.b32.cont [6/8] (short) (narrow) %v566_v54, 8  ;;  %v7756_v49 = vpop.trf.xlu1  ;;  %v4145_v54 = vrot.slane %v4137_v4, %v7097_v18  ;;  %v4170_v4 = vcombine.high %v4113_v5, %v4129_v20 }
 0x4e5   : > { %v4257_v10 = vcombine.low %v7739_v59, %v7756_v49  ;;  %v4249_v28 = vrot.slane %v4241_v38, %v7097_v18 }
 0x4e6   : > { %v7768_v33 = vpop.trf.xlu0  ;;  %5014 = vxpose.xlu0.b32.cont [7/8] (short) (narrow) %v559_v63, 8  ;;  %v4201_v63 = vcombine.low %v4145_v54, %v4161_v9  ;;  %v7796_v20 = vrot.slane %v4170_v4, %v7102_v27 }
 0x4e7   : > { %v4265_v14 = vrot.slane %v4257_v10, %v7097_v18 }
 0x4e8   : > { %5119 = vxpose.xlu1.b32.cont [7/8] (short) (narrow) %v567_v13, 8  ;;  %v7774_v12 = vpop.trf.xlu1  ;;  %v4202_v13 = vcombine.high %v4145_v54, %v4161_v9  ;;  %v4209_v5 = vrot.slane %v4201_v63, %v7102_v27 }
 0x4e9   : > { %v4305_v10 = vcombine.low %v4249_v28, %v4265_v14  ;;  %v4306_v23 = vcombine.high %v4249_v28, %v4265_v14 }
 0x4ea   : > { %v7784_v0 = vpop.trf.xlu0  ;;  %5015 = vxpose.xlu0.b32.end [8/8] (short) (narrow) %v560_v15, 8  ;;  %v4177_v15 = vrot.slane %v4169_v22, %v7102_v27  ;;  %v7800_v9 = vrot.slane %v4202_v13, %v7102_v27 }
 0x4eb   : > { %v4273_v42 = vcombine.low %v7768_v33, %v7784_v0  ;;  %v4313_v54 = vrot.slane %v4305_v10, %v7102_v27  ;;  %v7804_v28 = vrot.slane %v4306_v23, %v7102_v27  ;;  %v3426_v23 = vcombine.high %v7289_v57, %v7300_v8 }
 0x4ec   : > { %5120 = vxpose.xlu1.b32.end [8/8] (short) (narrow) %v568_v2, 8  ;;  %v7786_v58 = vpop.trf.xlu1  ;;  %v4233_v22 = vcombine.low %v4177_v15, %v4209_v5  ;;  %v4235_v63 = vcombine.low %v7796_v20, %v7800_v9  ;;  %v3306_v57 = vcombine.high %v7239_v39, %v7249_v43  ;;  %v3322_v8 = vcombine.high %v7258_v45, %v7270_v52 }
 0x4ed   : > { %v4289_v38 = vcombine.low %v7774_v12, %v7786_v58  ;;  %v4281_v56 = vrot.slane %v4273_v42, %v7097_v18  ;;  %v4098_v43 = vcombine.high %v7643_v50, %v7659_v19 }
 0x4ef   : > { %v4297_v16 = vrot.slane %v4289_v38, %v7097_v18 }
 0x4f1   : > { %v4337_v14 = vcombine.low %v4281_v56, %v4297_v16  ;;  %v4338_v2 = vcombine.high %v4281_v56, %v4297_v16  ;;  %v4393_v56 = vpop.trf.xlu0  ;;  %v3442_v16 = vcombine.high %v7295_v6, %v7311_v17  ;;  %v3338_v6 = vcombine.high %v7263_v47, %v7279_v53 }
 0x4f2   : > { %v8302_v17 = vmov 0.0   ;;  %v7855_v47 = vrot.slane %v3306_v57, %v7097_v18  ;;  %v7861_v53 = vrot.slane %v3322_v8, %v7097_v18  ;;  %v8304_v57 = vld [vmem:[#allocation10_spill] sm:$0xff] }
 0x4f3   : > { %v4345_v42 = vrot.slane %v4337_v14, %v7102_v27  ;;  %v7808_v38 = vrot.slane %v4338_v2, %v7102_v27  ;;  %v3474_v14 = vcombine.high %v7329_v26, %v7343_v32  ;;  %v3458_v2 = vcombine.high %v7322_v24, %v7336_v31 }
 0x4f4   : > { %v7837_v24 = vrot.slane %v3442_v16, %v7097_v18  ;;  %v7858_v52 = vrot.slane %v3338_v6, %v7097_v18  ;;  %v3962_v26 = vcombine.high %v7629_v55, %v7637_v46  ;;  %v4100_v16 = vcombine.high %v7646_v51, %v7662_v48 }
 0x4f5   : > { %v4369_v4 = vcombine.low %v4313_v54, %v4345_v42  ;;  %v4371_v13 = vcombine.low %v7804_v28, %v7808_v38  ;;  %v7846_v39 = vrot.slane %v3458_v2, %v7097_v18  ;;  %v4372_v48 = vcombine.high %v7804_v28, %v7808_v38 }
 0x4f6   : > { %v3401_v19 = vcombine.low %v7861_v53, %v7858_v52  ;;  %v4236_v6 = vcombine.high %v7796_v20, %v7800_v9  ;;  %v8306_v9 = vld [vmem:[#allocation11_spill] sm:$0xff] }
 0x4f7   : > { %v6546_v60 = vpack.c.bf16 %v4369_v4, %v4233_v22  ;;  %v6570_v10 = vpack.c.bf16 %v4371_v13, %v4235_v63  ;;  %v3290_v22 = vcombine.high %v7234_v37, %v7244_v41  ;;  %v7840_v37 = vrot.slane %v3426_v23, %v7097_v18 }
 0x4f8   : > { %v7843_v41 = vrot.slane %v3474_v14, %v7097_v18  ;;  %v4242_v4 = vcombine.high %v7732_v34, %v7747_v1  ;;  %v4274_v63 = vcombine.high %v7768_v33, %v7784_v0  ;;  %v3409_v13 = vrot.slane %v3401_v19, %v7102_v27  ;;  %v4499_v1 = vpop.trf.xlu1 }
 0x4f9   : > { %6547 = vmatpush3.bf16.msra.mxu1 %v6546_v60  ;;  %6571 = vmatpush3.bf16.msra.mxu0 %v6570_v10  ;;  %v7852_v45 = vrot.slane %v3290_v22, %v7097_v18  ;;  %v3505_v31 = vcombine.low %v7840_v37, %v7837_v24  ;;  %v4370_v60 = vcombine.high %v4313_v54, %v4345_v42 }
 0x4fa   : > { %6548 = vmatprep.subr.bf16.mxu1 %v8293_v35  ;;  %6584 = vmatprep.subr.bf16.mxu0 %v8293_v35  ;;  %v3537_v32 = vcombine.low %v7846_v39, %v7843_v41  ;;  %v4258_v54 = vcombine.high %v7739_v59, %v7756_v49  ;;  %v4290_v42 = vcombine.high %v7774_v12, %v7786_v58 }
 0x4fb   : > { %v3369_v50 = vcombine.low %v7852_v45, %v7855_v47  ;;  %v7876_v55 = vrot.slane %v3505_v31, %v7102_v27  ;;  %v4154_v10 = vcombine.high %v7693_v40, %v7718_v25  ;;  %v4138_v34 = vcombine.high %v7688_v7, %v7705_v44 }
 0x4fc   : > { %6382 = vmatmul.mubr.msk.f32.vlgmr.msra.gmra.mrb[0].mxu1 %vm396_vm0, %v4393_v56  ;;  %v3545_v46 = vrot.slane %v3537_v32, %v7102_v27  ;;  %v7897_v58 = vrot.slane %v4258_v54, %v7097_v18  ;;  %v7900_v59 = vrot.slane %v4242_v4, %v7097_v18  ;;  %v7903_v49 = vrot.slane %v4290_v42, %v7097_v18 }
 0x4fd   : > { %6550 = vmatpush3.bf16.msra.mxu1 %v7387_v29  ;;  %6400 = vmatprep.mubr.msk.f32.mxu1 %vm6842_vm1, %v8302_v17  ;;  %v6555_v29 = vpack.c.bf16 %v4098_v43, %v3962_v26  ;;  %v7906_v40 = vrot.slane %v4274_v63, %v7097_v18  ;;  %v7910_v7 = vrot.slane %v4154_v10, %v7097_v18  ;;  %v8305_v43 = vld [vmem:[#allocation14_spill] sm:$0xff] }
 0x4fe   : > { %6551 = vmatprep.subr.bf16.mxu1 %v8293_v35  ;;  %v3557_v12 = vcombine.low %v7876_v55, %v3545_v46  ;;  %v7913_v44 = vrot.slane %v4138_v34, %v7097_v18  ;;  %v4321_v33 = vcombine.low %v7900_v59, %v7897_v58  ;;  %v3964_v14 = vcombine.high %v7632_v61, %v7640_v36 }
 0x4ff   : > { %v4353_v0 = vcombine.low %v7906_v40, %v7903_v49  ;;  %v6582_v28 = vpack.c.bf16 %v4372_v48, %v4236_v6  ;;  %v3558_v8 = vcombine.high %v7876_v55, %v3545_v46  ;;  %v3402_v55 = vcombine.high %v7861_v53, %v7858_v52  ;;  %v8307_v46 = vld [vmem:[#allocation15_spill] sm:$0xff] }
 0x500   : > { %v4329_v2 = vrot.slane %v4321_v33, %v7102_v27  ;;  %v6579_v51 = vpack.c.bf16 %v4100_v16, %v3964_v14  ;;  %v4322_v53 = vcombine.high %v7900_v59, %v7897_v58  ;;  %v4354_v63 = vcombine.high %v7906_v40, %v7903_v49  ;;  %v8309_v40 = vld [vmem:[#allocation12_spill] sm:$0xff] }
 0x501   : > { %6553 = vmatpush3.bf16.msra.mxu1 %v7524_v30  ;;  %v4234_v30 = vcombine.high %v4177_v15, %v4209_v5  ;;  %v3377_v5 = vrot.slane %v3369_v50, %v7102_v27  ;;  %v4361_v22 = vrot.slane %v4353_v0, %v7102_v27  ;;  %v3538_v50 = vcombine.high %v7846_v39, %v7843_v41  ;;  %v8311_v33 = vld [vmem:[#allocation16_spill] sm:$0xff] }
 0x502   : > { %6554 = vmatprep.subr.bf16.mxu1 %v8293_v35  ;;  %v3416_v41 = vrot.slane %v3402_v55, %v7102_v27  ;;  %v4218_v34 = vcombine.high %v7913_v44, %v7910_v7  ;;  %v8308_v58 = vcombine.high %v7686_v3, %v7691_v62 }
 0x503   : > { %v6558_v15 = vpack.c.bf16 %v4370_v60, %v4234_v30  ;;  %v3421_v25 = vcombine.low %v3377_v5, %v3409_v13  ;;  %v4373_v38 = vcombine.low %v4329_v2, %v4361_v22  ;;  %v3422_v32 = vcombine.high %v3377_v5, %v3409_v13 }
 0x504   : > { %v3506_v60 = vcombine.high %v7840_v37, %v7837_v24  ;;  %v4374_v19 = vcombine.high %v4329_v2, %v4361_v22  ;;  %v3370_v30 = vcombine.high %v7852_v45, %v7855_v47  ;;  %v3552_v42 = vrot.slane %v3538_v50, %v7102_v27 }
 0x505   : > { %6556 = vmatpush3.bf16.msra.mxu1 %v6555_v29  ;;  %v6585_v56 = vpack.c.bf16 %v3557_v12, %v3421_v25  ;;  %v6597_v20 = vpack.c.bf16 %v3558_v8, %v3422_v32  ;;  %v4368_v12 = vrot.slane %v4354_v63, %v7102_v27  ;;  %v4200_v59 = vrot.slane %v8308_v58, %v7102_v27 }
 0x506   : > { %6557 = vmatprep.subr.bf16.mxu1 %v8293_v35  ;;  %v3520_v54 = vrot.slane %v3506_v60, %v7102_v27  ;;  %v3384_v37 = vrot.slane %v3370_v30, %v7102_v27  ;;  %v4232_v49 = vrot.slane %v4218_v34, %v7102_v27 }
 0x508   : > { %v3559_v39 = vcombine.low %v3520_v54, %v3552_v42  ;;  %v3560_v45 = vcombine.high %v3520_v54, %v3552_v42  ;;  %v3423_v47 = vcombine.low %v3384_v37, %v3416_v41  ;;  %v3424_v52 = vcombine.high %v3384_v37, %v3416_v41 }
 0x509   : > { %6559 = vmatpush3.bf16.msra.mxu1 %v6558_v15  ;;  %v4239_v0 = vcombine.low %v4200_v59, %v4232_v49 }
 0x50a   : > { %6572 = vmatprep.subr.bf16.mxu1 %v8293_v35  ;;  %v6609_v5 = vpack.c.bf16 %v3559_v39, %v3423_v47  ;;  %v6621_v10 = vpack.c.bf16 %v3560_v45, %v3424_v52 }
 0x50c   : > { %6401 = vmatmul.mubr.msk.f32.vlgmr.msra.gmra.mrb[2].mxu1 %vm396_vm0, %v4499_v1  ;;  %v4336_v1 = vrot.slane %v4322_v53, %v7102_v27 }
 0x50d   : > { %6574 = vmatpush3.bf16.msra.mxu1 %v7389_v11  ;;  %6438 = vmatprep.mubr.msk.f32.mxu1 %vm6842_vm1, %v8302_v17  ;;  %v4217_v11 = vcombine.low %v7913_v44, %v7910_v7  ;;  %v8310_v7 = vld [vmem:[#allocation13_spill] sm:$0xff] }
 0x50e   : > { %6575 = vmatprep.subr.bf16.mxu1 %v8293_v35  ;;  %v4604_v23 = vpop.trf.xlu0  ;;  %v4375_v44 = vcombine.low %v4336_v1, %v4368_v12  ;;  %v4376_v25 = vcombine.high %v4336_v1, %v4368_v12 }
 0x50f   : > { %6420 = vmatmul.mubr.msk.f32.vlgmr.msra.gmra.mrb[0].mxu0 %vm396_vm0, %v4604_v23  ;;  %v4225_v36 = vrot.slane %v4217_v11, %v7102_v27  ;;  %v8312_v23 = vld [vmem:[#allocation17_spill] sm:$0xff] }
 0x510   : > { %6586 = vmatpush3.bf16.msra.mxu0 %v6585_v56  ;;  %6457 = vmatprep.mubr.msk.f32.mxu0 %vm6842_vm1, %v8302_v17  ;;  %v4709_v26 = vpop.trf.xlu1 }
 0x511   : > { %6577 = vmatpush3.bf16.msra.mxu1 %v7529_v21  ;;  %6587 = vmatprep.subr.bf16.mxu0 %v8293_v35  ;;  %v8303_v21 = vcombine.low %v7686_v3, %v7691_v62  ;;  %v4240_v62 = vcombine.high %v4200_v59, %v4232_v49  ;;  %v6618_v3 = vpack.c.bf16 %v4375_v44, %v4239_v0 }
 0x512   : > { %6578 = vmatprep.subr.bf16.mxu1 %v8293_v35 }
 0x513   : > { %v4193_v61 = vrot.slane %v8303_v21, %v7102_v27  ;;  %v6630_v56 = vpack.c.bf16 %v4376_v25, %v4240_v62 }
 0x514   : > { %6589 = vmatpush3.bf16.msra.mxu0 %v8304_v57 }
 0x515   : > { %6580 = vmatpush3.bf16.msra.mxu1 %v6579_v51  ;;  %6590 = vmatprep.subr.bf16.mxu0 %v8293_v35  ;;  %v4237_v31 = vcombine.low %v4193_v61, %v4225_v36  ;;  %v4238_v4 = vcombine.high %v4193_v61, %v4225_v36 }
 0x516   : > { %6581 = vmatprep.subr.bf16.mxu1 %v8293_v35 }
 0x517   : > { %v6594_v29 = vpack.c.bf16 %v4373_v38, %v4237_v31  ;;  %v6606_v24 = vpack.c.bf16 %v4374_v19, %v4238_v4 }
 0x518   : > { %6592 = vmatpush3.bf16.msra.mxu0 %v8305_v43 }
 0x519   : > { %6583 = vmatpush3.bf16.msra.mxu1 %v6582_v28  ;;  %6593 = vmatprep.subr.bf16.mxu0 %v8293_v35 }
 0x51a   : > { %6596 = vmatprep.subr.bf16.mxu1 %v8293_v35 }
 0x51c   : > { %6439 = vmatmul.mubr.msk.f32.vlgmr.msra.gmra.mrb[4].mxu1 %vm396_vm0, %v4709_v26  ;;  %6595 = vmatpush3.bf16.msra.mxu0 %v6594_v29 }
 0x51d   : > { %6598 = vmatpush3.bf16.msra.mxu1 %v6597_v20  ;;  %6608 = vmatprep.subr.bf16.mxu0 %v8293_v35 }
 0x51e   : > { %6599 = vmatprep.subr.bf16.mxu1 %v8293_v35  ;;  %6476 = vmatprep.mubr.msk.f32.mxu1 %vm6842_vm1, %v8302_v17 }
 0x521   : > { %6601 = vmatpush3.bf16.msra.mxu1 %v8306_v9 }
 0x522   : > { %6602 = vmatprep.subr.bf16.mxu1 %v8293_v35 }
 0x525   : > { %6604 = vmatpush3.bf16.msra.mxu1 %v8307_v46 }
 0x526   : > { %6605 = vmatprep.subr.bf16.mxu1 %v8293_v35 }
 0x529   : > { %6607 = vmatpush3.bf16.msra.mxu1 %v6606_v24 }
 0x52a   : > { %6620 = vmatprep.subr.bf16.mxu1 %v8293_v35 }
 0x52e   : > { %v4814_v15 = vpop.trf.xlu0 }
 0x52f   : > { %6458 = vmatmul.mubr.msk.f32.vlgmr.msra.gmra.mrb[2].mxu0 %vm396_vm0, %v4814_v15 }
 0x530   : > { %v4919_v13 = vpop.trf.xlu1  ;;  %6610 = vmatpush3.bf16.msra.mxu0 %v6609_v5  ;;  %6495 = vmatprep.mubr.msk.f32.mxu0 %vm6842_vm1, %v8302_v17 }
 0x531   : > { %6477 = vmatmul.mubr.msk.f32.vlgmr.msra.gmra.mrb[6].mxu1 %vm396_vm0, %v4919_v13  ;;  %6611 = vmatprep.subr.bf16.mxu0 %v8293_v35 }
 0x532   : > { %6622 = vmatpush3.bf16.msra.mxu1 %v6621_v10  ;;  %6514 = vmatprep.mubr.msk.f32.mxu1 %vm6842_vm1, %v8302_v17 }
 0x533   : > { %6623 = vmatprep.subr.bf16.mxu1 %v8293_v35 }
 0x534   : > { %6613 = vmatpush3.bf16.msra.mxu0 %v8309_v40 }
 0x535   : > { %6614 = vmatprep.subr.bf16.mxu0 %v8293_v35 }
 0x536   : > { %6625 = vmatpush3.bf16.msra.mxu1 %v8310_v7 }
 0x537   : > { %6626 = vmatprep.subr.bf16.mxu1 %v8293_v35 }
 0x538   : > { %6616 = vmatpush3.bf16.msra.mxu0 %v8311_v33 }
 0x539   : > { %6617 = vmatprep.subr.bf16.mxu0 %v8293_v35 }
 0x53a   : > { %6628 = vmatpush3.bf16.msra.mxu1 %v8312_v23 }
 0x53b   : > { %6629 = vmatprep.subr.bf16.mxu1 %v8293_v35 }
 0x53c   : > { %6619 = vmatpush3.bf16.msra.mxu0 %v6618_v3 }
 0x53d   : > { %6632 = vmatprep.subr.bf16.mxu0 %v8293_v35 }
 0x53e   : > { %6631 = vmatpush3.bf16.msra.mxu1 %v6630_v56 }
 0x54e   : > { %v5024_v16 = vpop.trf.xlu0 }
 0x54f   : > { %6496 = vmatmul.mubr.msk.f32.vlgmr.msra.gmra.mrb[4].mxu0 %vm396_vm0, %v5024_v16 }
 0x550   : > { %v5129_v11 = vpop.trf.xlu1  ;;  %6533 = vmatprep.mubr.msk.f32.mxu0 %vm6842_vm1, %v8302_v17 }
 0x551   : > { %6515 = vmatmul.mubr.msk.f32.vlgmr.msra.gmra.mrb[8].mxu1 %vm396_vm0, %v5129_v11 }
 0x5cf   : > { %v4479_v14 = vpop.f32.mrb[0].mxu1 }
 0x5d0   : > { %v6383_v2 = vpop.f32.mrb[1].mxu1  ;;  %5218 = vxpose.xlu0.b32.start.end [1/1] (short) (narrow) %v4479_v14, 8 }
 0x5df   : > { %v4584_v22 = vpop.f32.mrb[2].mxu1 }
 0x5e0   : > { %5250 = vxpose.xlu1.b32.start.end [1/1] (short) (narrow) %v4584_v22, 8  ;;  %v6402_v51 = vpop.f32.mrb[3].mxu1 }
 0x5e2   : > { %v4689_v48 = vpop.f32.mrb[0].mxu0 }
 0x5e3   : > { %5282 = vxpose.xlu0.b32.start.end [1/1] (short) (narrow) %v4689_v48, 8  ;;  %v6421_v21 = vpop.f32.mrb[1].mxu0 }
 0x5ef   : > { %v4794_v61 = vpop.f32.mrb[4].mxu1 }
 0x5f0   : > { %5314 = vxpose.xlu1.b32.start.end [1/1] (short) (narrow) %v4794_v61, 8  ;;  %v6440_v36 = vpop.f32.mrb[5].mxu1 }
 0x602   : > { %v4899_v57 = vpop.f32.mrb[2].mxu0 }
 0x603   : > { %v6459_v28 = vpop.f32.mrb[3].mxu0  ;;  %5346 = vxpose.xlu0.b32.start.end [1/1] (short) (narrow) %v4899_v57, 8  ;;  %v6260_v57 = vld [vmem:[%s8270_s4] ss:$0 sm:$0xff] }
 0x604   : > { %v5004_v6 = vpop.f32.mrb[6].mxu1 }
 0x605   : > { %v6478_v38 = vpop.f32.mrb[7].mxu1  ;;  %5378 = vxpose.xlu1.b32.start.end [1/1] (short) (narrow) %v5004_v6, 8 }
 0x622   : > { %v5109_v8 = vpop.f32.mrb[4].mxu0 }
 0x623   : > { %5410 = vxpose.xlu0.b32.start.end [1/1] (short) (narrow) %v5109_v8, 8  ;;  %v6497_v43 = vpop.f32.mrb[5].mxu0 }
 0x624   : > { %v5214_v26 = vpop.f32.mrb[8].mxu1 }
 0x625   : > { %5442 = vxpose.xlu1.b32.start.end [1/1] (short) (narrow) %v5214_v26, 8  ;;  %v6516_v31 = vpop.f32.mrb[9].mxu1  ;;  %v5692_v26 = vld [vmem:[%s8273_s7] sm:$0xff] }
 0x626   : > { %v5693_v31 = vld [vmem:[%s8273_s7 + $0x8] sm:$0xff] }
 0x650   : > { %v5234_v32 = vpop.trf.xlu0 }
 0x660   : > { %v5266_v29 = vpop.trf.xlu1 }
 0x663   : > { %v5298_v20 = vpop.trf.xlu0 }
 0x664   : > { %v5474_v9 = vcombine.low %v5234_v32, %v5298_v20  ;;  %v6633_v32 = vpack.c.bf16 %v5693_v31, %v5692_v26  ;;  %v5814_v26 = vld [vmem:[%s7011_s19 + $0x48] sm:$0xff] }
 0x666   : > { %v5481_v19 = vrot.slane %v5474_v9, %v7097_v18  ;;  %6635 = vmatpush3.bf16.xpose.msk.msra.mxu0 %vm8040_vm11, %v6633_v32 }
 0x667   : > { %6636 = vmatprep.subr.bf16.mxu0 %v8293_v35 }
 0x670   : > { %v5330_v60 = vpop.trf.xlu1 }
 0x671   : > { %v5482_v50 = vcombine.low %v5266_v29, %v5330_v60 }
 0x673   : > { %v5489_v30 = vrot.slane %v5482_v50, %v7097_v18 }
 0x675   : > { %v5506_v55 = vcombine.low %v5481_v19, %v5489_v30  ;;  %v5507_v46 = vcombine.high %v5481_v19, %v5489_v30  ;;  %v5694_v30 = vld [vmem:[%s8273_s7 + $0x10] sm:$0xff] }
 0x677   : > { %v5514_v4 = vrot.slane %v5506_v55, %v7102_v27  ;;  %v5521_v54 = vrot.slane %v5507_v46, %v7102_v27  ;;  %v5695_v55 = vld [vmem:[%s8273_s7 + $0x18] sm:$0xff] }
 0x678   : > { %v6637_v46 = vpack.c.bf16 %v5695_v55, %v5694_v30  ;;  %v5817_v30 = vld [vmem:[%s7011_s19 + $0x60] sm:$0xff]  ;;  %v5818_v55 = vld [vmem:[%s7011_s19 + $0x68] sm:$0xff] }
 0x679   : > { %v6256_v42 = vcombine.low %v5514_v4, %v5521_v54  ;;  %v6258_v24 = vcombine.high %v5514_v4, %v5521_v54  ;;  %v5696_v4 = vld [vmem:[%s8273_s7 + $0x20] sm:$0xff]  ;;  %v5697_v54 = vld [vmem:[%s8273_s7 + $0x28] sm:$0xff] }
 0x67a   : > { %6639 = vmatpush3.bf16.xpose.msk.msra.mxu0 %vm8040_vm11, %v6637_v46 }
 0x67b   : > { %v5550_v37 = vrot.slane %v6256_v42, %v7097_v18  ;;  %v5566_v41 = vrot.slane %v6258_v24, %v7097_v18  ;;  %6640 = vmatprep.subr.bf16.mxu0 %v8293_v35  ;;  %v6641_v42 = vpack.c.bf16 %v5697_v54, %v5696_v4  ;;  %v5698_v24 = vld [vmem:[%s8273_s7 + $0x30] sm:$0xff] }
 0x67d   : > { %v5575_v39 = vcombine.high %v5550_v37, %v5566_v41  ;;  %v5574_v45 = vcombine.low %v5550_v37, %v5566_v41  ;;  %v5699_v37 = vld [vmem:[%s8273_s7 + $0x38] sm:$0xff] }
 0x67e   : > { %v6645_v41 = vpack.c.bf16 %v5699_v37, %v5698_v24 }
 0x67f   : > { %v5589_v47 = vrot.slane %v5575_v39, %v7102_v27  ;;  %v5582_v52 = vrot.slane %v5574_v45, %v7102_v27 }
 0x681   : > { %5615 = vrot.lane.b32.xlu1 %v5589_v47, %s6843_s16  ;;  %v5606_v53 = vcombine.high %v5582_v52, %v8302_v17  ;;  %v5607_v63 = vcombine.high %v5589_v47, %v8302_v17  ;;  %s6850_s16 = smov [#allocation6]  }
 0x682   : > { %6643 = vmatpush3.bf16.xpose.msk.msra.mxu0 %vm8040_vm11, %v6641_v42 }
 0x683   : > { %5611 = vrot.lane.b32.xlu0 %v5606_v53, %s6844_s17  ;;  %v5362_v15 = vpop.trf.xlu0  ;;  %6644 = vmatprep.subr.bf16.mxu0 %v8293_v35  ;;  %v6261_v35 = vld [vmem:[%s8271_s5] ss:$0 sm:$0xff]  ;;  %s6762_s17 = sshll.u32 %s6850_s16, 4  ;;  %s6763_s17 = int_to_ptr.vmem [resolvable:$false] %s6762_s17 }
 0x685   : > { %5619 = vrot.lane.b32.xlu1 %v5607_v63, %s6845_s26  ;;  %v5394_v5 = vpop.trf.xlu1  ;;  %v6262_v63 = vld [vmem:[%s8272_s6] ss:$0 sm:$0xff]  ;;  %s6764_s26 = scalar_lea.vmem %s6763_s17, 16384 }
 0x68a   : > { %6647 = vmatpush3.bf16.xpose.msk.msra.mxu0 %vm8040_vm11, %v6645_v41  ;;  %v5823_v41 = vld [vmem:[%s7011_s19 + $0x90] sm:$0xff] }
 0x6a3   : > { %v5426_v13 = vpop.trf.xlu0 }
 0x6a4   : > { %v5490_v10 = vcombine.low %v5362_v15, %v5426_v13 }
 0x6a5   : > { %v5458_v34 = vpop.trf.xlu1 }
 0x6a6   : > { %v5498_v1 = vcombine.low %v5394_v5, %v5458_v34  ;;  %v5497_v12 = vrot.slane %v5490_v10, %v7097_v18  ;;  %v6263_v10 = vld [vmem:[%s8274_s8] ss:$0 sm:$0xff] }
 0x6a7   : > { %v8315_v34 = vld [vmem:[#allocation9_spill] sm:$0xff] }
 0x6a8   : > { %v5505_v58 = vrot.slane %v5498_v1, %v7097_v18  ;;  %v5871_v1 = vsub.s32 0, %v8315_v34 }
 0x6aa   : > { %v5522_v59 = vcombine.low %v5497_v12, %v5505_v58  ;;  %v5523_v49 = vcombine.high %v5497_v12, %v5505_v58 }
 0x6ac   : > { %v5530_v40 = vrot.slane %v5522_v59, %v7102_v27  ;;  %v5537_v7 = vrot.slane %v5523_v49, %v7102_v27 }
 0x6ae   : > { %v6257_v44 = vcombine.low %v5530_v40, %v5537_v7  ;;  %v6259_v25 = vcombine.high %v5530_v40, %v5537_v7  ;;  %v5906_v40 = vsub.s32 1, %v8315_v34 }
 0x6b0   : > { %v5557_v33 = vrot.slane %v6257_v44, %v7097_v18  ;;  %v5573_v0 = vrot.slane %v6259_v25, %v7097_v18  ;;  %v5941_v44 = vsub.s32 2, %v8315_v34 }
 0x6b2   : > { %v5591_v23 = vcombine.high %v5557_v33, %v5573_v0  ;;  %v5590_v62 = vcombine.low %v5557_v33, %v5573_v0  ;;  %v5976_v33 = vsub.s32 3, %v8315_v34  ;;  %v5825_v34 = vld [vmem:[%s7011_s19 + $0xa0] sm:$0xff] }
 0x6b4   : > { %v5605_v3 = vrot.slane %v5591_v23, %v7102_v27  ;;  %v5598_v56 = vrot.slane %v5590_v62, %v7102_v27  ;;  %v5807_v23 = vld [vmem:[%s7011_s19 + $0x10] sm:$0xff]  ;;  %v5808_v62 = vld [vmem:[%s7011_s19 + $0x18] sm:$0xff] }
 0x6b6   : > { %5631 = vrot.lane.b32.xlu0 %v5605_v3, %s6846_s20  ;;  %5623 = vrot.lane.b32.xlu1 %v5598_v56, %s6847_s25  ;;  %v5608_v16 = vcombine.high %v5598_v56, %v8302_v17  ;;  %v5609_v11 = vcombine.high %v5605_v3, %v8302_v17  ;;  %v5805_v3 = vld [vmem:[%s7011_s19] sm:$0xff]  ;;  %v5806_v56 = vld [vmem:[%s7011_s19 + $0x8] sm:$0xff]  ;;  %s6283_s25 = sshll.u32 %s6924_s13, 13 }
 0x6b7   : > { %s8216_s13 = scalar_lea.hbm %s8275_s9, %s6283_s25 }
 0x6ba   : > { %5627 = vrot.lane.b32.xlu1 %v5608_v16, %s6848_s23  ;;  %s6152_s23 = sshll.u32 %s7029_s27, 4  ;;  %s8218_s23 = int_to_ptr.vmem [resolvable:$true] %s6152_s23 }
 0x6bb   : > { %s6758_s14 = scalar_lea.vmem %s8218_s23, 8192  ;;  %p6765_p10 = scmp.lt.s32.totalorder %s8218_s23, %s6763_s17 }
 0x6bc   : > { %p6759_p11 = scmp.ne.s32.totalorder %s8218_s23, %s6758_s14  ;;  %p6766_p0 = scmp.lt.s32.totalorder %s6764_s26, %s6758_s14 }
 0x6be   : > { %5635 = vrot.lane.b32.xlu1 %v5609_v11, %s6849_s24  ;;  %p6760_p13 = pnand %p6759_p11, %p8316_p12  ;;  %p6767_p2 = por %p6766_p0, %p6765_p10 }
 0x6c0   : > { %p6761_p8 = pneg %p6760_p13 }
 0x6c2   : > { %p6768_p4 = pnand %p6767_p2, %p6761_p8 }
 0x6f3   : > { %v5616_v14 = vpop.permute.xlu1 %5615 }
 0x6f5   : > { %v5612_v18 = vpop.permute.xlu0 %5611 }
 0x6f6   : > { %v5639_v22 = vsel %vm5638_vm2, %v5582_v52, %v5612_v18 }
 0x6f7   : > { %v5620_v2 = vpop.permute.xlu1 %5619  ;;  %v5641_v27 = vsel %vm5640_vm3, %v5639_v22, %v5616_v14 }
 0x6f8   : > { %v5643_v48 = vsel %vm5642_vm4, %v5641_v27, %v5620_v2  ;;  %v5811_v27 = vld [vmem:[%s7011_s19 + $0x30] sm:$0xff] }
 0x728   : > { %v5624_v51 = vpop.permute.xlu1 %5623  ;;  %v5632_v17 = vpop.permute.xlu0 %5631 }
 0x729   : > { %v5645_v21 = vsel %vm5644_vm5, %v5643_v48, %v5624_v51  ;;  %v5812_v51 = vld [vmem:[%s7011_s19 + $0x38] sm:$0xff]  ;;  %v5809_v48 = vld [vmem:[%s7011_s19 + $0x20] sm:$0xff] }
 0x72c   : > { %v5628_v61 = vpop.permute.xlu1 %5627 }
 0x72d   : > { %v5647_v36 = vsel %vm5646_vm6, %v5645_v21, %v5628_v61  ;;  %v5810_v21 = vld [vmem:[%s7011_s19 + $0x28] sm:$0xff] }
 0x72e   : > { %v5649_v28 = vsel %vm5648_vm7, %v5647_v36, %v5632_v17 }
 0x730   : > { %v5636_v6 = vpop.permute.xlu1 %5635 }
 0x731   : > { %v5651_v38 = vsel %vm5650_vm8, %v5649_v28, %v5636_v6 }
 0x732   : > { %v5659_v8 = vadd.f32 %v6260_v57, %v5651_v38  ;;  %v5815_v38 = vld [vmem:[%s7011_s19 + $0x50] sm:$0xff] }
 0x734   : > { %v5661_v43 = vsel %vm5660_vm9, %v5659_v8, 0.0 }
 0x735   : > { %5662 = vadd.xlane.f32.xlu0 %v5661_v43  ;;  %v5813_v43 = vld [vmem:[%s7011_s19 + $0x40] sm:$0xff] }
 0x7c2   : > { %v5663_v20 = vpop.xlane.xlu0 %5662 }
 0x7c3   : > { %v5665_v9 = vmul.f32 0.0625, %v5663_v20 }
 0x7c5   : > { %v5666_v60 = vsub.f32 %v5659_v8, %v5665_v9  ;;  %v5816_v8 = vld [vmem:[%s7011_s19 + $0x58] sm:$0xff] }
 0x7c7   : > { %v5667_v50 = vmul.f32 %v5666_v60, %v5666_v60 }
 0x7c9   : > { %v5668_v19 = vsel %vm5660_vm9, %v5667_v50, 0.0  ;;  %v5819_v50 = vld [vmem:[%s7011_s19 + $0x70] sm:$0xff] }
 0x7ca   : > { %5669 = vadd.xlane.f32.xlu1 %v5668_v19  ;;  %v5820_v19 = vld [vmem:[%s7011_s19 + $0x78] sm:$0xff] }
 0x857   : > { %v5670_v39 = vpop.xlane.xlu1 %5669 }
 0x858   : > { %v5671_v45 = vmul.f32 0.0625, %v5670_v39  ;;  %v5824_v39 = vld [vmem:[%s7011_s19 + $0x98] sm:$0xff] }
 0x85a   : > { %v5672_v47 = vadd.f32 1e-05, %v5671_v45  ;;  %v5821_v45 = vld [vmem:[%s7011_s19 + $0x80] sm:$0xff] }
 0x85c   : > { %6726 = vrsqrt.f32 %v5672_v47  ;;  %v5822_v47 = vld [vmem:[%s7011_s19 + $0x88] sm:$0xff] }
 0x866   : > { %v6727_v52 = vpop.eup %6726 }
 0x867   : > { %v5674_v53 = vmul.f32 %v6727_v52, %v5666_v60 }
 0x869   : > { %v5682_v15 = vmul.f32 %v6261_v35, %v5674_v53 }
 0x86b   : > { %v5690_v5 = vadd.f32 %v6262_v63, %v5682_v15 }
 0x86d   : > { %v5691_v13 = vmax.f32 %v5690_v5, 0.0 }
 0x86f   : > { %6534 = vmatmul.mubr.msk.f32.vlgmr.msra.gmra.mrb[6].mxu0 %vm5707_vm10, %v5691_v13  ;;  %v5827_v13 = vld [vmem:[%s7011_s19 + $0xb0] sm:$0xff] }
 0x942   : > { %v5801_v12 = vpop.f32.mrb[6].mxu0 }
 0x943   : > { %v5802_v58 = vadd.f32 %v6263_v10, %v5801_v12  ;;  %v6535_v59 = vpop.f32.mrb[7].mxu0  ;;  %v5828_v10 = vld [vmem:[%s7011_s19 + $0xb8] sm:$0xff] }
 0x945   : > { %v5872_v49 = vrot.slane %v5802_v58, %v5871_v1  ;;  %v5907_v7 = vrot.slane %v5802_v58, %v5906_v40  ;;  %v5942_v25 = vrot.slane %v5802_v58, %v5941_v44  ;;  %v5977_v0 = vrot.slane %v5802_v58, %v5976_v33  ;;  %v5826_v1 = vld [vmem:[%s7011_s19 + $0xa8] sm:$0xff]  ;;  %v5831_v44 = vld [vmem:[%s7011_s19 + $0xd0] sm:$0xff]  ;;  %v5829_v33 = vld [vmem:[%s7011_s19 + $0xc0] sm:$0xff] }
 0x947   : > { %5878 = vbcast.lane.b32.xlu1 %v5872_v49, 264  ;;  %5874 = vbcast.lane.b32.xlu0 %v5872_v49, 256 }
 0x94b   : > { %5886 = vbcast.lane.b32.xlu1 %v5872_v49, 280  ;;  %5882 = vbcast.lane.b32.xlu0 %v5872_v49, 272 }
 0x94f   : > { %5894 = vbcast.lane.b32.xlu1 %v5872_v49, 296  ;;  %5890 = vbcast.lane.b32.xlu0 %v5872_v49, 288 }
 0x953   : > { %5902 = vbcast.lane.b32.xlu1 %v5872_v49, 312  ;;  %5898 = vbcast.lane.b32.xlu0 %v5872_v49, 304 }
 0x957   : > { %5913 = vbcast.lane.b32.xlu1 %v5907_v7, 264  ;;  %5909 = vbcast.lane.b32.xlu0 %v5907_v7, 256 }
 0x95b   : > { %5921 = vbcast.lane.b32.xlu1 %v5907_v7, 280  ;;  %5917 = vbcast.lane.b32.xlu0 %v5907_v7, 272 }
 0x95f   : > { %5929 = vbcast.lane.b32.xlu1 %v5907_v7, 296  ;;  %5925 = vbcast.lane.b32.xlu0 %v5907_v7, 288 }
 0x963   : > { %5937 = vbcast.lane.b32.xlu1 %v5907_v7, 312  ;;  %5933 = vbcast.lane.b32.xlu0 %v5907_v7, 304 }
 0x967   : > { %5948 = vbcast.lane.b32.xlu1 %v5942_v25, 264  ;;  %5944 = vbcast.lane.b32.xlu0 %v5942_v25, 256 }
 0x96b   : > { %5956 = vbcast.lane.b32.xlu1 %v5942_v25, 280  ;;  %5952 = vbcast.lane.b32.xlu0 %v5942_v25, 272 }
 0x96f   : > { %5964 = vbcast.lane.b32.xlu1 %v5942_v25, 296  ;;  %5960 = vbcast.lane.b32.xlu0 %v5942_v25, 288 }
 0x973   : > { %5972 = vbcast.lane.b32.xlu1 %v5942_v25, 312  ;;  %5968 = vbcast.lane.b32.xlu0 %v5942_v25, 304  ;;  %v5832_v25 = vld [vmem:[%s7011_s19 + $0xd8] sm:$0xff] }
 0x977   : > { %5983 = vbcast.lane.b32.xlu1 %v5977_v0, 264  ;;  %5979 = vbcast.lane.b32.xlu0 %v5977_v0, 256 }
 0x97b   : > { %5991 = vbcast.lane.b32.xlu1 %v5977_v0, 280  ;;  %5987 = vbcast.lane.b32.xlu0 %v5977_v0, 272 }
 0x97f   : > { %5999 = vbcast.lane.b32.xlu1 %v5977_v0, 296  ;;  %5995 = vbcast.lane.b32.xlu0 %v5977_v0, 288 }
 0x983   : > { %6007 = vbcast.lane.b32.xlu1 %v5977_v0, 312  ;;  %6003 = vbcast.lane.b32.xlu0 %v5977_v0, 304  ;;  %v5830_v0 = vld [vmem:[%s7011_s19 + $0xc8] sm:$0xff] }
 0x9b9   : > { %v5879_v16 = vpop.permute.xlu1 %5878  ;;  %v5875_v11 = vpop.permute.xlu0 %5874 }
 0x9ba   : > { %v6011_v14 = vadd.f32 %v5879_v16, %v5807_v23  ;;  %v6012_v18 = vadd.f32 %v5879_v16, %v5808_v62  ;;  %v6009_v2 = vadd.f32 %v5875_v11, %v5805_v3  ;;  %v6010_v22 = vadd.f32 %v5875_v11, %v5806_v56 }
 0x9bc   : > { %6075 = vst [vmem:[%s7029_s27 + $0x10] sm:$0xff] %v6011_v14  ;;  %6076 = vst [vmem:[%s7029_s27 + $0x18] sm:$0xff] %v6012_v18  ;;  %v5835_v14 = vld [vmem:[%s7011_s19 + $0xf0] sm:$0xff]  ;;  %v5836_v18 = vld [vmem:[%s7011_s19 + $0xf8] sm:$0xff] }
 0x9bd   : > { %6073 = vst [vmem:[%s7029_s27] sm:$0xff] %v6009_v2  ;;  %6074 = vst [vmem:[%s7029_s27 + $0x8] sm:$0xff] %v6010_v22  ;;  %v5887_v61 = vpop.permute.xlu1 %5886  ;;  %v5883_v36 = vpop.permute.xlu0 %5882  ;;  %v5833_v2 = vld [vmem:[%s7011_s19 + $0xe0] sm:$0xff]  ;;  %v5834_v22 = vld [vmem:[%s7011_s19 + $0xe8] sm:$0xff] }
 0x9be   : > { %v6015_v17 = vadd.f32 %v5887_v61, %v5811_v27  ;;  %v6016_v57 = vadd.f32 %v5887_v61, %v5812_v51  ;;  %v6013_v6 = vadd.f32 %v5883_v36, %v5809_v48  ;;  %v6014_v28 = vadd.f32 %v5883_v36, %v5810_v21 }
 0x9c0   : > { %6079 = vst [vmem:[%s7029_s27 + $0x30] sm:$0xff] %v6015_v17  ;;  %6080 = vst [vmem:[%s7029_s27 + $0x38] sm:$0xff] %v6016_v57  ;;  %v5839_v17 = vld [vmem:[%s7011_s19 + $0x110] sm:$0xff]  ;;  %v5840_v57 = vld [vmem:[%s7011_s19 + $0x118] sm:$0xff] }
 0x9c1   : > { %6077 = vst [vmem:[%s7029_s27 + $0x20] sm:$0xff] %v6013_v6  ;;  %6078 = vst [vmem:[%s7029_s27 + $0x28] sm:$0xff] %v6014_v28  ;;  %v5895_v31 = vpop.permute.xlu1 %5894  ;;  %v5891_v32 = vpop.permute.xlu0 %5890  ;;  %v5837_v6 = vld [vmem:[%s7011_s19 + $0x100] sm:$0xff]  ;;  %v5838_v28 = vld [vmem:[%s7011_s19 + $0x108] sm:$0xff] }
 0x9c2   : > { %v6019_v29 = vadd.f32 %v5895_v31, %v5815_v38  ;;  %v6020_v20 = vadd.f32 %v5895_v31, %v5816_v8  ;;  %v6017_v9 = vadd.f32 %v5891_v32, %v5813_v43  ;;  %v6018_v60 = vadd.f32 %v5891_v32, %v5814_v26 }
 0x9c4   : > { %6083 = vst [vmem:[%s7029_s27 + $0x50] sm:$0xff] %v6019_v29  ;;  %6084 = vst [vmem:[%s7029_s27 + $0x58] sm:$0xff] %v6020_v20  ;;  %v5843_v29 = vld [vmem:[%s7011_s19 + $0x130] sm:$0xff]  ;;  %v5844_v20 = vld [vmem:[%s7011_s19 + $0x138] sm:$0xff] }
 0x9c5   : > { %6081 = vst [vmem:[%s7029_s27 + $0x40] sm:$0xff] %v6017_v9  ;;  %6082 = vst [vmem:[%s7029_s27 + $0x48] sm:$0xff] %v6018_v60  ;;  %v5903_v46 = vpop.permute.xlu1 %5902  ;;  %v5899_v4 = vpop.permute.xlu0 %5898  ;;  %v5841_v9 = vld [vmem:[%s7011_s19 + $0x120] sm:$0xff]  ;;  %v5842_v60 = vld [vmem:[%s7011_s19 + $0x128] sm:$0xff] }
 0x9c6   : > { %v6023_v54 = vadd.f32 %v5903_v46, %v5819_v50  ;;  %v6024_v42 = vadd.f32 %v5903_v46, %v5820_v19  ;;  %v6021_v24 = vadd.f32 %v5899_v4, %v5817_v30  ;;  %v6022_v37 = vadd.f32 %v5899_v4, %v5818_v55 }
 0x9c8   : > { %6087 = vst [vmem:[%s7029_s27 + $0x70] sm:$0xff] %v6023_v54  ;;  %6088 = vst [vmem:[%s7029_s27 + $0x78] sm:$0xff] %v6024_v42  ;;  %v5847_v54 = vld [vmem:[%s7011_s19 + $0x150] sm:$0xff]  ;;  %v5848_v42 = vld [vmem:[%s7011_s19 + $0x158] sm:$0xff] }
 0x9c9   : > { %6085 = vst [vmem:[%s7029_s27 + $0x60] sm:$0xff] %v6021_v24  ;;  %6086 = vst [vmem:[%s7029_s27 + $0x68] sm:$0xff] %v6022_v37  ;;  %v5914_v52 = vpop.permute.xlu1 %5913  ;;  %v5910_v35 = vpop.permute.xlu0 %5909  ;;  %v5845_v24 = vld [vmem:[%s7011_s19 + $0x140] sm:$0xff]  ;;  %v5846_v37 = vld [vmem:[%s7011_s19 + $0x148] sm:$0xff] }
 0x9ca   : > { %v6027_v53 = vadd.f32 %v5914_v52, %v5823_v41  ;;  %v6028_v63 = vadd.f32 %v5914_v52, %v5824_v39  ;;  %v6025_v15 = vadd.f32 %v5910_v35, %v5821_v45  ;;  %v6026_v5 = vadd.f32 %v5910_v35, %v5822_v47 }
 0x9cc   : > { %6091 = vst [vmem:[%s7029_s27 + $0x90] sm:$0xff] %v6027_v53  ;;  %6092 = vst [vmem:[%s7029_s27 + $0x98] sm:$0xff] %v6028_v63  ;;  %v5851_v53 = vld [vmem:[%s7011_s19 + $0x170] sm:$0xff]  ;;  %v5852_v63 = vld [vmem:[%s7011_s19 + $0x178] sm:$0xff] }
 0x9cd   : > { %6089 = vst [vmem:[%s7029_s27 + $0x80] sm:$0xff] %v6025_v15  ;;  %6090 = vst [vmem:[%s7029_s27 + $0x88] sm:$0xff] %v6026_v5  ;;  %v5922_v12 = vpop.permute.xlu1 %5921  ;;  %v5918_v58 = vpop.permute.xlu0 %5917  ;;  %v5849_v15 = vld [vmem:[%s7011_s19 + $0x160] sm:$0xff]  ;;  %v5850_v5 = vld [vmem:[%s7011_s19 + $0x168] sm:$0xff] }
 0x9ce   : > { %v6031_v59 = vadd.f32 %v5922_v12, %v5827_v13  ;;  %v6032_v49 = vadd.f32 %v5922_v12, %v5828_v10  ;;  %v6029_v40 = vadd.f32 %v5918_v58, %v5825_v34  ;;  %v6030_v7 = vadd.f32 %v5918_v58, %v5826_v1 }
 0x9d0   : > { %6095 = vst [vmem:[%s7029_s27 + $0xb0] sm:$0xff] %v6031_v59  ;;  %6096 = vst [vmem:[%s7029_s27 + $0xb8] sm:$0xff] %v6032_v49  ;;  %v5855_v59 = vld [vmem:[%s7011_s19 + $0x190] sm:$0xff]  ;;  %v5856_v49 = vld [vmem:[%s7011_s19 + $0x198] sm:$0xff] }
 0x9d1   : > { %6093 = vst [vmem:[%s7029_s27 + $0xa0] sm:$0xff] %v6029_v40  ;;  %6094 = vst [vmem:[%s7029_s27 + $0xa8] sm:$0xff] %v6030_v7  ;;  %v5930_v23 = vpop.permute.xlu1 %5929  ;;  %v5926_v62 = vpop.permute.xlu0 %5925  ;;  %v5853_v40 = vld [vmem:[%s7011_s19 + $0x180] sm:$0xff]  ;;  %v5854_v7 = vld [vmem:[%s7011_s19 + $0x188] sm:$0xff] }
 0x9d2   : > { %v6035_v3 = vadd.f32 %v5930_v23, %v5831_v44  ;;  %v6036_v56 = vadd.f32 %v5930_v23, %v5832_v25  ;;  %v6033_v16 = vadd.f32 %v5926_v62, %v5829_v33  ;;  %v6034_v11 = vadd.f32 %v5926_v62, %v5830_v0 }
 0x9d4   : > { %6099 = vst [vmem:[%s7029_s27 + $0xd0] sm:$0xff] %v6035_v3  ;;  %6100 = vst [vmem:[%s7029_s27 + $0xd8] sm:$0xff] %v6036_v56  ;;  %v5859_v3 = vld [vmem:[%s7011_s19 + $0x1b0] sm:$0xff]  ;;  %v5860_v56 = vld [vmem:[%s7011_s19 + $0x1b8] sm:$0xff] }
 0x9d5   : > { %6097 = vst [vmem:[%s7029_s27 + $0xc0] sm:$0xff] %v6033_v16  ;;  %6098 = vst [vmem:[%s7029_s27 + $0xc8] sm:$0xff] %v6034_v11  ;;  %v5938_v27 = vpop.permute.xlu1 %5937  ;;  %v5934_v51 = vpop.permute.xlu0 %5933  ;;  %v5857_v16 = vld [vmem:[%s7011_s19 + $0x1a0] sm:$0xff]  ;;  %v5858_v11 = vld [vmem:[%s7011_s19 + $0x1a8] sm:$0xff] }
 0x9d6   : > { %v6039_v48 = vadd.f32 %v5938_v27, %v5835_v14  ;;  %v6040_v21 = vadd.f32 %v5938_v27, %v5836_v18  ;;  %v6037_v61 = vadd.f32 %v5934_v51, %v5833_v2  ;;  %v6038_v36 = vadd.f32 %v5934_v51, %v5834_v22 }
 0x9d8   : > { %6103 = vst [vmem:[%s7029_s27 + $0xf0] sm:$0xff] %v6039_v48  ;;  %6104 = vst [vmem:[%s7029_s27 + $0xf8] sm:$0xff] %v6040_v21  ;;  %v5863_v48 = vld [vmem:[%s7011_s19 + $0x1d0] sm:$0xff]  ;;  %v5864_v21 = vld [vmem:[%s7011_s19 + $0x1d8] sm:$0xff] }
 0x9d9   : > { %6101 = vst [vmem:[%s7029_s27 + $0xe0] sm:$0xff] %v6037_v61  ;;  %6102 = vst [vmem:[%s7029_s27 + $0xe8] sm:$0xff] %v6038_v36  ;;  %v5949_v38 = vpop.permute.xlu1 %5948  ;;  %v5945_v8 = vpop.permute.xlu0 %5944  ;;  %v5861_v61 = vld [vmem:[%s7011_s19 + $0x1c0] sm:$0xff]  ;;  %v5862_v36 = vld [vmem:[%s7011_s19 + $0x1c8] sm:$0xff] }
 0x9da   : > { %v6043_v43 = vadd.f32 %v5949_v38, %v5839_v17  ;;  %v6044_v26 = vadd.f32 %v5949_v38, %v5840_v57  ;;  %v6041_v31 = vadd.f32 %v5945_v8, %v5837_v6  ;;  %v6042_v32 = vadd.f32 %v5945_v8, %v5838_v28 }
 0x9dc   : > { %6107 = vst [vmem:[%s7029_s27 + $0x110] sm:$0xff] %v6043_v43  ;;  %6108 = vst [vmem:[%s7029_s27 + $0x118] sm:$0xff] %v6044_v26  ;;  %v5867_v43 = vld [vmem:[%s7011_s19 + $0x1f0] sm:$0xff]  ;;  %v5868_v26 = vld [vmem:[%s7011_s19 + $0x1f8] sm:$0xff] }
 0x9dd   : > { %6105 = vst [vmem:[%s7029_s27 + $0x100] sm:$0xff] %v6041_v31  ;;  %6106 = vst [vmem:[%s7029_s27 + $0x108] sm:$0xff] %v6042_v32  ;;  %v5957_v50 = vpop.permute.xlu1 %5956  ;;  %v5953_v19 = vpop.permute.xlu0 %5952  ;;  %v5865_v31 = vld [vmem:[%s7011_s19 + $0x1e0] sm:$0xff]  ;;  %v5866_v32 = vld [vmem:[%s7011_s19 + $0x1e8] sm:$0xff]  ;;  %s6138_s19 = scalar_lea.sflag [#allocation5], %s7007_s29 }
 0x9de   : > { %v6047_v30 = vadd.f32 %v5957_v50, %v5843_v29  ;;  %v6048_v55 = vadd.f32 %v5957_v50, %v5844_v20  ;;  %v6045_v46 = vadd.f32 %v5953_v19, %v5841_v9  ;;  %v6046_v4 = vadd.f32 %v5953_v19, %v5842_v60 }
 0x9e0   : > { %6111 = vst [vmem:[%s7029_s27 + $0x130] sm:$0xff] %v6047_v30  ;;  %6112 = vst [vmem:[%s7029_s27 + $0x138] sm:$0xff] %v6048_v55 }
 0x9e1   : > { %6109 = vst [vmem:[%s7029_s27 + $0x120] sm:$0xff] %v6045_v46  ;;  %6110 = vst [vmem:[%s7029_s27 + $0x128] sm:$0xff] %v6046_v4  ;;  %v5965_v41 = vpop.permute.xlu1 %5964  ;;  %v5961_v39 = vpop.permute.xlu0 %5960 }
 0x9e2   : > { %v6051_v45 = vadd.f32 %v5965_v41, %v5847_v54  ;;  %v6052_v47 = vadd.f32 %v5965_v41, %v5848_v42  ;;  %v6049_v52 = vadd.f32 %v5961_v39, %v5845_v24  ;;  %v6050_v35 = vadd.f32 %v5961_v39, %v5846_v37 }
 0x9e4   : > { %6115 = vst [vmem:[%s7029_s27 + $0x150] sm:$0xff] %v6051_v45  ;;  %6116 = vst [vmem:[%s7029_s27 + $0x158] sm:$0xff] %v6052_v47 }
 0x9e5   : > { %6113 = vst [vmem:[%s7029_s27 + $0x140] sm:$0xff] %v6049_v52  ;;  %6114 = vst [vmem:[%s7029_s27 + $0x148] sm:$0xff] %v6050_v35  ;;  %v5973_v13 = vpop.permute.xlu1 %5972  ;;  %v5969_v10 = vpop.permute.xlu0 %5968 }
 0x9e6   : > { %v6055_v34 = vadd.f32 %v5973_v13, %v5851_v53  ;;  %v6056_v1 = vadd.f32 %v5973_v13, %v5852_v63  ;;  %v6053_v12 = vadd.f32 %v5969_v10, %v5849_v15  ;;  %v6054_v58 = vadd.f32 %v5969_v10, %v5850_v5 }
 0x9e8   : > { %6119 = vst [vmem:[%s7029_s27 + $0x170] sm:$0xff] %v6055_v34  ;;  %6120 = vst [vmem:[%s7029_s27 + $0x178] sm:$0xff] %v6056_v1 }
 0x9e9   : > { %6117 = vst [vmem:[%s7029_s27 + $0x160] sm:$0xff] %v6053_v12  ;;  %6118 = vst [vmem:[%s7029_s27 + $0x168] sm:$0xff] %v6054_v58  ;;  %v5984_v44 = vpop.permute.xlu1 %5983  ;;  %v5980_v25 = vpop.permute.xlu0 %5979 }
 0x9ea   : > { %v6059_v33 = vadd.f32 %v5984_v44, %v5855_v59  ;;  %v6060_v0 = vadd.f32 %v5984_v44, %v5856_v49  ;;  %v6057_v23 = vadd.f32 %v5980_v25, %v5853_v40  ;;  %v6058_v62 = vadd.f32 %v5980_v25, %v5854_v7 }
 0x9ec   : > { %6123 = vst [vmem:[%s7029_s27 + $0x190] sm:$0xff] %v6059_v33  ;;  %6124 = vst [vmem:[%s7029_s27 + $0x198] sm:$0xff] %v6060_v0 }
 0x9ed   : > { %6121 = vst [vmem:[%s7029_s27 + $0x180] sm:$0xff] %v6057_v23  ;;  %6122 = vst [vmem:[%s7029_s27 + $0x188] sm:$0xff] %v6058_v62  ;;  %v5992_v14 = vpop.permute.xlu1 %5991  ;;  %v5988_v18 = vpop.permute.xlu0 %5987 }
 0x9ee   : > { %v6063_v2 = vadd.f32 %v5992_v14, %v5859_v3  ;;  %v6064_v22 = vadd.f32 %v5992_v14, %v5860_v56  ;;  %v6061_v27 = vadd.f32 %v5988_v18, %v5857_v16  ;;  %v6062_v51 = vadd.f32 %v5988_v18, %v5858_v11 }
 0x9f0   : > { %6127 = vst [vmem:[%s7029_s27 + $0x1b0] sm:$0xff] %v6063_v2  ;;  %6128 = vst [vmem:[%s7029_s27 + $0x1b8] sm:$0xff] %v6064_v22 }
 0x9f1   : > { %6125 = vst [vmem:[%s7029_s27 + $0x1a0] sm:$0xff] %v6061_v27  ;;  %6126 = vst [vmem:[%s7029_s27 + $0x1a8] sm:$0xff] %v6062_v51  ;;  %v6000_v17 = vpop.permute.xlu1 %5999  ;;  %v5996_v57 = vpop.permute.xlu0 %5995 }
 0x9f2   : > { %v6067_v6 = vadd.f32 %v6000_v17, %v5863_v48  ;;  %v6068_v28 = vadd.f32 %v6000_v17, %v5864_v21  ;;  %v6065_v38 = vadd.f32 %v5996_v57, %v5861_v61  ;;  %v6066_v8 = vadd.f32 %v5996_v57, %v5862_v36 }
 0x9f4   : > { %6131 = vst [vmem:[%s7029_s27 + $0x1d0] sm:$0xff] %v6067_v6  ;;  %6132 = vst [vmem:[%s7029_s27 + $0x1d8] sm:$0xff] %v6068_v28 }
 0x9f5   : > { %6129 = vst [vmem:[%s7029_s27 + $0x1c0] sm:$0xff] %v6065_v38  ;;  %6130 = vst [vmem:[%s7029_s27 + $0x1c8] sm:$0xff] %v6066_v8  ;;  %v6008_v29 = vpop.permute.xlu1 %6007  ;;  %v6004_v20 = vpop.permute.xlu0 %6003 }
 0x9f6   : > { %v6071_v9 = vadd.f32 %v6008_v29, %v5867_v43  ;;  %v6072_v60 = vadd.f32 %v6008_v29, %v5868_v26  ;;  %v6069_v50 = vadd.f32 %v6004_v20, %v5865_v31  ;;  %v6070_v19 = vadd.f32 %v6004_v20, %v5866_v32 }
 0x9f8   : > { %6135 = vst [vmem:[%s7029_s27 + $0x1f0] sm:$0xff] %v6071_v9  ;;  %6136 = vst [vmem:[%s7029_s27 + $0x1f8] sm:$0xff] %v6072_v60 }
 0x9f9   : > { %6133 = vst [vmem:[%s7029_s27 + $0x1e0] sm:$0xff] %v6069_v50  ;;  %6134 = vst [vmem:[%s7029_s27 + $0x1e8] sm:$0xff] %v6070_v19 }
 0x9fa   : > { %6771 = shalt.err (!%p6768_p4)
}
 0x9fb   : > { %s6772_s27 = scalar_lea.hbm %s8216_s13, 8192  ;;  %s6776_s24 = scalar_lea.hbm %s8275_s9, 16384 }
 0x9fc   : > { %p6773_p5 = scmp.ne.s32.totalorder %s8216_s13, %s6772_s27  ;;  %p6777_p1 = scmp.lt.u32.totalorder %s8216_s13, %s8275_s9 }
 0x9fd   : > { %p6778_p3 = scmp.lt.u32.totalorder %s6776_s24, %s6772_s27  ;;  %p6780_p11 = scmp.lt.u32.totalorder %s6772_s27, %s8216_s13 }
 0x9fe   : > { %p6774_p7 = pnand %p6773_p5, %p8316_p12 }
 0x9ff   : > { %p6779_p6 = por %p6778_p3, %p6777_p1 }
 0xa00   : > { %p6775_p9 = pneg %p6774_p7 }
 0xa01   : > { %p6781_p13 = por %p6780_p11, %p6779_p6 }
 0xa03   : > { %p6782_p8 = pnand %p6781_p13, %p6775_p9 }
 0xa05   : > { %6785 = shalt.err (!%p6782_p8)
}
 0xa06   : > { %s6851_s14 = smov 256   ;;  %s6852_s17 = smov 16  }
 0xa07   : > { %6650 = dma.vmem_to_hbm [thread:$0]  (%p8316_p12), %s8218_s23, 8192, %s8216_s13, %s6138_s19, %s6851_s14, %s6851_s14, %s6852_s17  }
 0xa08 PF: > { %s6167_s26 = sand.u32 1, %s6816_s30   ;;  %p8317_p10 = scmp.ne.s32.totalorder %s8286_s22, 0 }
 0xa09   : > { %p8318_p0 = scmp.ge.s32.totalorder %s6828_s12, 2  ;;  %s6168_s27 = scalar_lea.sflag [#allocation5], %s6167_s26 }
 0xa0b   : > { %p6657_p2 = pnand %p8318_p0, %p8317_p10 }
 0xa0d   : > { %6811 = dma.done.wait (!%p6657_p2), %s6168_s27, 8192  }
 0xa0e   : > { %6813 = vsyncadd (!%p6657_p2), %s6168_s27, 4294959104  ;;  %p22_p4 = scmp.ge.s32.totalorder %s6928_s15, 4   ;;  %s8319_s30 = smov %s6820_s10 }
 0xa0f   : > { %s8320_s10 = smov %s6824_s11  ;;  %s8321_s11 = smov %s6940_s18 }
 0xa10   : > { %s8322_s12 = smov %s6928_s15  ;;  %24 = sbr.rel (!%p22_p4) target bundleno = 5 (0x5), region = 121 }
 0xa17   :  { %6173 = vsyncpa [#allocation4], 1 }
 0xa18   :  { %6175 = vsyncpa [#allocation4 + $0x1], 1 }
 0xa19   :  { %6176 = vsyncpa [#allocation5], 1 }
 0xa1a   :  { %6178 = vsyncpa [#allocation5 + $0x1], 1 }

</bundles_post_ra>
